<compile_context>
chip_gen: v7x
topology: tpu7x:2x2x1
jax: 0.10.0
libtpu: 0.0.40
codegen_flags: <defaults>
</compile_context>

<pallas_src>
import numpy as np
import jax
import jax.numpy as jnp
from jax.experimental import pallas as pl
from jax.experimental.pallas import tpu as pltpu

# ----- small config consistent with the module -----
B = 2            # batch
S = 8            # sequence length
H = 32           # config.hidden_size
HID = H // 2     # BiLSTM per-direction hidden size
NUM_LABELS = 3   # config.num_labels
HEAD_SIZE = 64   # GlobalPointer head_size (module default)
VOCAB = 50
BIG_NEG = 1e12
D_GP = NUM_LABELS * 2 * HEAD_SIZE          # 384
D_GP2 = 2 * D_GP                           # 768  (gp || gp@rot)


# ---------------------------------------------------------------------------
# Pallas kernel: one grid step = one batch element (batch axis is "parallel").
# Fuses: BiLSTM recurrence (both directions in one loop), GlobalPointer dense
# projection (+pre-rotated copy), RoPE mixing, per-head q@k.T, masking, scaling.
# ---------------------------------------------------------------------------
def gp_bilstm_kernel(seq_ref, mask_ref,
                     af_ref, ab_ref, whh_ref, bl_ref,
                     wgf_ref, wgb_ref, bg_ref,
                     cos_ref, sin_ref, rev_ref,
                     out_ref,
                     hs_scr):
    seq = seq_ref[0]                                   # [S, H]
    rev = rev_ref[...]                                 # [S, S] reversal permutation
    seq_rev = jnp.dot(rev, seq, preferred_element_type=jnp.float32)

    # Input projection for BOTH directions and ALL timesteps, hoisted out of the
    # recurrence. Column layout (grouped gates): [i_f,i_b,f_f,f_b,g_f,g_b,o_f,o_b],
    # g-gate columns pre-scaled by 2 on the host; bias folded in here.
    xp = (jnp.dot(seq, af_ref[...], preferred_element_type=jnp.float32)
          + jnp.dot(seq_rev, ab_ref[...], preferred_element_type=jnp.float32)
          + bl_ref[...])                               # [S, 8*HID] = [8, 128]

    whh = whh_ref[...]                                 # [2*HID, 8*HID] block-diagonal

    # Fused recurrence: lanes 0:HID = forward state (time t),
    #                   lanes HID:2*HID = backward state (time S-1-t).
    h = jnp.zeros((1, 2 * HID), jnp.float32)
    c = jnp.zeros((1, 2 * HID), jnp.float32)
    G = 2 * HID
    for t in range(S):                                 # fully unrolled (S=8, static)
        gates = xp[t:t + 1, :] + jnp.dot(h, whh, preferred_element_type=jnp.float32)
        s = jax.nn.sigmoid(gates)                      # single EUP pass over 128 lanes
        i_g = s[:, 0:G]
        f_g = s[:, G:2 * G]
        g_g = 2.0 * s[:, 2 * G:3 * G] - 1.0            # tanh(x) = 2*sigmoid(2x)-1
        o_g = s[:, 3 * G:4 * G]
        c = f_g * c + i_g * g_g
        h = o_g * jnp.tanh(c)
        hs_scr[pl.ds(t, 1), :] = h                     # off the serial dependency chain

    hs = hs_scr[...]                                   # [S, 2*HID]
    fwd = hs[:, :HID]                                  # time order
    bwd = jnp.dot(rev, hs[:, HID:], preferred_element_type=jnp.float32)  # -> time order

    # GlobalPointer dense projection; columns are [gp | gp @ rot] (rotation folded
    # into the weights on the host), split by fwd/bwd halves of the hidden state.
    gp_all = (jnp.dot(fwd, wgf_ref[...], preferred_element_type=jnp.float32)
              + jnp.dot(bwd, wgb_ref[...], preferred_element_type=jnp.float32)
              + bg_ref[...])                           # [S, 2*D_GP]

    cos = cos_ref[...]                                 # [S, HEAD_SIZE]
    sin = sin_ref[...]

    # Masks hoisted out of the label loop.
    # TODO(synk): canonical PyTorch GlobalPointer also masks padded *query rows*;
    # this matches the module-as-tested (key/column padding mask only).
    mask_row = mask_ref[0]                             # [1, S]
    pad = jnp.broadcast_to(mask_row, (S, S))           # pad[m, n] = mask[n]
    row = jax.lax.broadcasted_iota(jnp.int32, (S, S), 0)
    col = jax.lax.broadcasted_iota(jnp.int32, (S, S), 1)
    tril = (row > col).astype(jnp.float32)             # strict lower triangle
    scale = 1.0 / (HEAD_SIZE ** 0.5)
    pad_s = pad * scale
    neg_s = ((1.0 - pad) + tril) * (BIG_NEG * scale)

    for l in range(NUM_LABELS):                        # small static head loop
        base = l * 2 * HEAD_SIZE
        q = gp_all[:, base: base + HEAD_SIZE]
        k = gp_all[:, base + HEAD_SIZE: base + 2 * HEAD_SIZE]
        q2 = gp_all[:, D_GP + base: D_GP + base + HEAD_SIZE]          # q @ rot
        k2 = gp_all[:, D_GP + base + HEAD_SIZE: D_GP + base + 2 * HEAD_SIZE]
        qr = q * cos + q2 * sin
        kr = k * cos + k2 * sin
        logits = jnp.dot(qr, kr.T, preferred_element_type=jnp.float32)  # [S, S]
        out_ref[0, l, :, :] = logits * pad_s - neg_s


# ---------------------------------------------------------------------------
# Host-side weight preparation (pure algebra, done once).
# ---------------------------------------------------------------------------
def prepare_kernel_params(p):
    def place(w, direction, scale_g=True):
        # w: [..., 4*HID] in raw i|f|g|o layout for one direction.
        # Returns [..., 8*HID] in grouped layout [i_f,i_b,f_f,f_b,g_f,g_b,o_f,o_b]
        # with zeros in the other direction's columns and 2x pre-scale on g.
        zeros = jnp.zeros_like(w[..., :HID])
        parts = []
        for g in range(4):
            blk = w[..., g * HID:(g + 1) * HID]
            if g == 2 and scale_g:
                blk = blk * 2.0
            if direction == 0:
                parts.extend([blk, zeros])
            else:
                parts.extend([zeros, blk])
        return jnp.concatenate(parts, axis=-1)

    A_f = place(p["wih_f"], 0)                                        # [H, 8*HID]
    A_b = place(p["wih_b"], 1)                                        # [H, 8*HID]
    whh = jnp.concatenate([place(p["whh_f"], 0),
                           place(p["whh_b"], 1)], axis=0)             # [2*HID, 8*HID]
    # TODO(synk): PyTorch nn.LSTM has b_ih + b_hh per direction; a single bias per
    # direction is used here (equivalent for this self-contained test).
    b_lstm = place(p["b_f"], 0) + place(p["b_b"], 1)                  # [1, 8*HID]

    # RoPE rotate-pairs matrix, folded into the GP dense weights (block-diagonal).
    rot = np.zeros((HEAD_SIZE, HEAD_SIZE), np.float32)
    for i in range(HEAD_SIZE // 2):
        rot[2 * i, 2 * i + 1] = 1.0
        rot[2 * i + 1, 2 * i] = -1.0
    R_big = jnp.asarray(np.kron(np.eye(2 * NUM_LABELS, dtype=np.float32), rot))
    w_gp_rot = p["w_gp"] @ R_big
    b_gp_rot = p["b_gp"] @ R_big
    W_big = jnp.concatenate([p["w_gp"], w_gp_rot], axis=-1)           # [H, 2*D_GP]
    b_big = jnp.concatenate([p["b_gp"], b_gp_rot], axis=-1)           # [1, 2*D_GP]

    rev = jnp.asarray(np.eye(S, dtype=np.float32)[::-1].copy())       # [S, S]

    return dict(A_f=A_f, A_b=A_b, whh=whh, b_lstm=b_lstm,
                W_f=W_big[:HID, :], W_b=W_big[HID:, :], b_gp=b_big,
                cos=p["cos"], sin=p["sin"], rev=rev)


def global_pointer_bilstm_pallas(seq_out, attn_mask, kp):
    Bq, Sq, Hq = seq_out.shape
    mask3 = attn_mask.astype(jnp.float32).reshape(Bq, 1, Sq)

    grid_spec = pltpu.PrefetchScalarGridSpec(
        num_scalar_prefetch=0,
        grid=(Bq,),
        in_specs=[
            pl.BlockSpec((1, Sq, Hq), lambda b: (b, 0, 0)),           # sequence_output
            pl.BlockSpec((1, 1, Sq), lambda b: (b, 0, 0)),            # attention mask
            pl.BlockSpec((Hq, 8 * HID), lambda b: (0, 0)),            # A_f (wih fwd, permuted)
            pl.BlockSpec((Hq, 8 * HID), lambda b: (0, 0)),            # A_b (wih bwd, permuted)
            pl.BlockSpec((2 * HID, 8 * HID), lambda b: (0, 0)),       # whh block-diagonal
            pl.BlockSpec((1, 8 * HID), lambda b: (0, 0)),             # fused LSTM bias
            pl.BlockSpec((HID, D_GP2), lambda b: (0, 0)),             # GP dense W (fwd half)
            pl.BlockSpec((HID, D_GP2), lambda b: (0, 0)),             # GP dense W (bwd half)
            pl.BlockSpec((1, D_GP2), lambda b: (0, 0)),               # GP dense bias (+rot)
            pl.BlockSpec((Sq, HEAD_SIZE), lambda b: (0, 0)),          # RoPE cos
            pl.BlockSpec((Sq, HEAD_SIZE), lambda b: (0, 0)),          # RoPE sin
            pl.BlockSpec((Sq, Sq), lambda b: (0, 0)),                 # reversal permutation
        ],
        out_specs=pl.BlockSpec((1, NUM_LABELS, Sq, Sq), lambda b: (b, 0, 0, 0)),
        scratch_shapes=[pltpu.VMEM((Sq, 2 * HID), jnp.float32)],      # fused hidden states
    )
    return pl.pallas_call(
        gp_bilstm_kernel,
        out_shape=jax.ShapeDtypeStruct((Bq, NUM_LABELS, Sq, Sq), jnp.float32),
        grid_spec=grid_spec,
        compiler_params=pltpu.CompilerParams(dimension_semantics=("parallel",)),
    )(seq_out, mask3,
      kp["A_f"], kp["A_b"], kp["whh"], kp["b_lstm"],
      kp["W_f"], kp["W_b"], kp["b_gp"],
      kp["cos"], kp["sin"], kp["rev"])


# ---------------------------------------------------------------------------
# Deterministic parameter construction (shapes follow the nn.Module __init__).
# ---------------------------------------------------------------------------
def init_params(key):
    keys = jax.random.split(key, 9)
    s = 0.1
    p = {
        "emb":   jax.random.normal(keys[0], (VOCAB, H), jnp.float32) * s,
        "wih_f": jax.random.normal(keys[1], (H, 4 * HID), jnp.float32) * s,
        "whh_f": jax.random.normal(keys[2], (HID, 4 * HID), jnp.float32) * s,
        "b_f":   jax.random.normal(keys[3], (1, 4 * HID), jnp.float32) * s,
        "wih_b": jax.random.normal(keys[4], (H, 4 * HID), jnp.float32) * s,
        "whh_b": jax.random.normal(keys[5], (HID, 4 * HID), jnp.float32) * s,
        "b_b":   jax.random.normal(keys[6], (1, 4 * HID), jnp.float32) * s,
        "w_gp":  jax.random.normal(keys[7], (H, D_GP), jnp.float32) * s,
        "b_gp":  jax.random.normal(keys[8], (1, D_GP), jnp.float32) * s,
    }
    # sinusoidal position embedding (GlobalPointer RoPE), already repeat_interleave'd
    pos = np.arange(S, dtype=np.float32)[:, None]
    inv = np.power(10000.0, -2.0 * np.arange(HEAD_SIZE // 2, dtype=np.float32) / HEAD_SIZE)
    ang = pos * inv[None, :]                                    # [S, HEAD_SIZE//2]
    p["cos"] = jnp.asarray(np.repeat(np.cos(ang), 2, axis=-1))  # [S, HEAD_SIZE]
    p["sin"] = jnp.asarray(np.repeat(np.sin(ang), 2, axis=-1))
    return p


# ---------------------------------------------------------------------------
# Pure-JAX reference (mirrors the PyTorch forward semantics) for verification.
# ---------------------------------------------------------------------------
def reference_forward(seq_out, attn_mask, p):
    Bq, Sq, Hq = seq_out.shape

    def lstm_dir(x, wih, whh, b, reverse):
        xs = x[:, ::-1, :] if reverse else x
        def step(carry, x_t):
            h, c = carry
            gates = x_t @ wih + h @ whh + b
            i = jax.nn.sigmoid(gates[:, :HID])
            f = jax.nn.sigmoid(gates[:, HID:2 * HID])
            g = jnp.tanh(gates[:, 2 * HID:3 * HID])
            o = jax.nn.sigmoid(gates[:, 3 * HID:])
            c = f * c + i * g
            h = o * jnp.tanh(c)
            return (h, c), h
        h0 = jnp.zeros((Bq, HID), jnp.float32)
        c0 = jnp.zeros((Bq, HID), jnp.float32)
        _, hs = jax.lax.scan(step, (h0, c0), jnp.swapaxes(xs, 0, 1))
        hs = jnp.swapaxes(hs, 0, 1)
        return hs[:, ::-1, :] if reverse else hs

    fwd = lstm_dir(seq_out, p["wih_f"], p["whh_f"], p["b_f"], False)
    bwd = lstm_dir(seq_out, p["wih_b"], p["whh_b"], p["b_b"], True)
    out = jnp.concatenate([fwd, bwd], axis=-1)                      # [B, S, H]

    gp = out @ p["w_gp"] + p["b_gp"]
    gp = gp.reshape(Bq, Sq, NUM_LABELS, 2 * HEAD_SIZE)
    q, k = gp[..., :HEAD_SIZE], gp[..., HEAD_SIZE:]
    cos = p["cos"][None, :, None, :]
    sin = p["sin"][None, :, None, :]

    def rope(x):
        x2 = jnp.stack([-x[..., 1::2], x[..., ::2]], axis=-1).reshape(x.shape)
        return x * cos + x2 * sin

    q, k = rope(q), rope(k)
    logits = jnp.einsum('bmhd,bnhd->bhmn', q, k)
    pad = jnp.broadcast_to(attn_mask[:, None, None, :].astype(jnp.float32), logits.shape)
    logits = logits * pad - (1.0 - pad) * BIG_NEG
    tril = jnp.tril(jnp.ones((Sq, Sq), jnp.float32), -1)
    logits = logits - tril * BIG_NEG
    return logits / (HEAD_SIZE ** 0.5)


if __name__ == "__main__":
    key = jax.random.PRNGKey(0)
    pkey, ikey = jax.random.split(key)
    params = init_params(pkey)
    kernel_params = prepare_kernel_params(params)

    input_ids = jax.random.randint(ikey, (B, S), 0, VOCAB)
    attention_mask = jnp.array([[1] * S, [1] * (S - 2) + [0, 0]], dtype=jnp.int32)

    # TODO(synk): the external transformer `encoder` is an injected dependency in the
    # PyTorch module; it is stood in by a deterministic embedding lookup producing
    # sequence_output [B, S, H] (glue, not the kernel hot path).
    sequence_output = params["emb"][input_ids]

    # nn.LSTM dropout=0.1 is a no-op for a single-layer LSTM / eval mode.
    logits = global_pointer_bilstm_pallas(sequence_output, attention_mask, kernel_params)
    logits = jax.block_until_ready(logits)

    ref = reference_forward(sequence_output, attention_mask, params)
    np.testing.assert_allclose(np.asarray(logits), np.asarray(ref), rtol=2e-3, atol=2e-3)

    print("KERNEL_OK")
</pallas_src>

<mosaic_0001>
module attributes {stable_mosaic.version = 11 : i64} {
  func.func @gp_bilstm_kernel(%arg0: i32, %arg1: memref<1x8x32xf32, #tpu.memory_space<vmem>>, %arg2: memref<1x1x8xf32, #tpu.memory_space<vmem>>, %arg3: memref<32x128xf32, #tpu.memory_space<vmem>>, %arg4: memref<32x128xf32, #tpu.memory_space<vmem>>, %arg5: memref<32x128xf32, #tpu.memory_space<vmem>>, %arg6: memref<1x128xf32, #tpu.memory_space<vmem>>, %arg7: memref<16x768xf32, #tpu.memory_space<vmem>>, %arg8: memref<16x768xf32, #tpu.memory_space<vmem>>, %arg9: memref<1x768xf32, #tpu.memory_space<vmem>>, %arg10: memref<8x64xf32, #tpu.memory_space<vmem>>, %arg11: memref<8x64xf32, #tpu.memory_space<vmem>>, %arg12: memref<8x8xf32, #tpu.memory_space<vmem>>, %arg13: memref<1x3x8x8xf32, #tpu.memory_space<vmem>>, %arg14: memref<8x32xf32, #tpu.memory_space<vmem>>) attributes {dimension_semantics = [#tpu.dimension_semantics<parallel>], iteration_bounds = array<i64: 2>, scalar_prefetch = 0 : i64, scratch_operands = 1 : i64, tpu.core_type = #tpu.core_type<tc>, window_params = [{transform_indices = @transform_0, window_bounds = array<i64: 1, 8, 32>}, {transform_indices = @transform_1, window_bounds = array<i64: 1, 1, 8>}, {pipeline_mode = #tpu.pipeline_mode<synchronous>, transform_indices = @transform_2, window_bounds = array<i64: 32, 128>}, {pipeline_mode = #tpu.pipeline_mode<synchronous>, transform_indices = @transform_3, window_bounds = array<i64: 32, 128>}, {pipeline_mode = #tpu.pipeline_mode<synchronous>, transform_indices = @transform_4, window_bounds = array<i64: 32, 128>}, {pipeline_mode = #tpu.pipeline_mode<synchronous>, transform_indices = @transform_5, window_bounds = array<i64: 1, 128>}, {pipeline_mode = #tpu.pipeline_mode<synchronous>, transform_indices = @transform_6, window_bounds = array<i64: 16, 768>}, {pipeline_mode = #tpu.pipeline_mode<synchronous>, transform_indices = @transform_7, window_bounds = array<i64: 16, 768>}, {pipeline_mode = #tpu.pipeline_mode<synchronous>, transform_indices = @transform_8, window_bounds = array<i64: 1, 768>}, {pipeline_mode = #tpu.pipeline_mode<synchronous>, transform_indices = @transform_9, window_bounds = array<i64: 8, 64>}, {pipeline_mode = #tpu.pipeline_mode<synchronous>, transform_indices = @transform_10, window_bounds = array<i64: 8, 64>}, {pipeline_mode = #tpu.pipeline_mode<synchronous>, transform_indices = @transform_11, window_bounds = array<i64: 8, 8>}, {transform_indices = @transform_12, window_bounds = array<i64: 1, 3, 8, 8>}]} {
    %c0 = arith.constant 0 : index
    %c0_0 = arith.constant 0 : index
    %c0_1 = arith.constant 0 : index
    %0 = vector.load %arg1[%c0, %c0_0, %c0_1] : memref<1x8x32xf32, #tpu.memory_space<vmem>>, vector<1x8x32xf32>
    %1 = vector.shape_cast %0 : vector<1x8x32xf32> to vector<8x32xf32>
    %c0_2 = arith.constant 0 : index
    %c0_3 = arith.constant 0 : index
    %2 = vector.load %arg12[%c0_2, %c0_3] : memref<8x8xf32, #tpu.memory_space<vmem>>, vector<8x8xf32>
    %cst = arith.constant dense<0.000000e+00> : vector<8x32xf32>
    %3 = tpu.matmul %2, %1, %cst {dimension_numbers = #tpu.dot_dimension_numbers<[1], [0], [0], [1], [0, 0, 1, 1], [], []>} : vector<8x8xf32>, vector<8x32xf32>, vector<8x32xf32> -> vector<8x32xf32>
    %c0_4 = arith.constant 0 : index
    %c0_5 = arith.constant 0 : index
    %4 = vector.load %arg3[%c0_4, %c0_5] : memref<32x128xf32, #tpu.memory_space<vmem>>, vector<32x128xf32>
    %cst_6 = arith.constant dense<0.000000e+00> : vector<8x128xf32>
    %5 = tpu.matmul %1, %4, %cst_6 {dimension_numbers = #tpu.dot_dimension_numbers<[1], [0], [0], [1], [0, 0, 1, 1], [], []>} : vector<8x32xf32>, vector<32x128xf32>, vector<8x128xf32> -> vector<8x128xf32>
    %c0_7 = arith.constant 0 : index
    %c0_8 = arith.constant 0 : index
    %6 = vector.load %arg4[%c0_7, %c0_8] : memref<32x128xf32, #tpu.memory_space<vmem>>, vector<32x128xf32>
    %cst_9 = arith.constant dense<0.000000e+00> : vector<8x128xf32>
    %7 = tpu.matmul %3, %6, %cst_9 {dimension_numbers = #tpu.dot_dimension_numbers<[1], [0], [0], [1], [0, 0, 1, 1], [], []>} : vector<8x32xf32>, vector<32x128xf32>, vector<8x128xf32> -> vector<8x128xf32>
    %8 = arith.addf %5, %7 : vector<8x128xf32>
    %c0_10 = arith.constant 0 : index
    %c0_11 = arith.constant 0 : index
    %9 = vector.load %arg6[%c0_10, %c0_11] : memref<1x128xf32, #tpu.memory_space<vmem>>, vector<1x128xf32>
    %10 = vector.broadcast %9 : vector<1x128xf32> to vector<8x128xf32>
    %11 = arith.addf %8, %10 : vector<8x128xf32>
    %c0_12 = arith.constant 0 : index
    %c0_13 = arith.constant 0 : index
    %12 = vector.load %arg5[%c0_12, %c0_13] : memref<32x128xf32, #tpu.memory_space<vmem>>, vector<32x128xf32>
    %cst_14 = arith.constant 0.000000e+00 : f32
    %13 = vector.broadcast %cst_14 : f32 to vector<1x32xf32>
    %cst_15 = arith.constant 0.000000e+00 : f32
    %14 = vector.broadcast %cst_15 : f32 to vector<1x32xf32>
    %15 = vector.extract_strided_slice %11 {offsets = [0, 0], sizes = [1, 128], strides = [1, 1]} : vector<8x128xf32> to vector<1x128xf32>
    %cst_16 = arith.constant dense<0.000000e+00> : vector<1x128xf32>
    %16 = tpu.matmul %13, %12, %cst_16 {dimension_numbers = #tpu.dot_dimension_numbers<[1], [0], [0], [1], [0, 0, 1, 1], [], []>} : vector<1x32xf32>, vector<32x128xf32>, vector<1x128xf32> -> vector<1x128xf32>
    %17 = arith.addf %15, %16 : vector<1x128xf32>
    %18 = arith.negf %17 : vector<1x128xf32>
    %19 = math.exp %18 : vector<1x128xf32>
    %cst_17 = arith.constant 1.000000e+00 : f32
    %20 = vector.broadcast %cst_17 : f32 to vector<1x128xf32>
    %21 = arith.addf %20, %19 : vector<1x128xf32>
    %22 = arith.divf %20, %21 : vector<1x128xf32>
    %23 = vector.extract_strided_slice %22 {offsets = [0, 0], sizes = [1, 32], strides = [1, 1]} : vector<1x128xf32> to vector<1x32xf32>
    %24 = vector.extract_strided_slice %22 {offsets = [0, 32], sizes = [1, 32], strides = [1, 1]} : vector<1x128xf32> to vector<1x32xf32>
    %25 = vector.extract_strided_slice %22 {offsets = [0, 64], sizes = [1, 32], strides = [1, 1]} : vector<1x128xf32> to vector<1x32xf32>
    %cst_18 = arith.constant 2.000000e+00 : f32
    %26 = vector.broadcast %cst_18 : f32 to vector<1x32xf32>
    %27 = arith.mulf %26, %25 : vector<1x32xf32>
    %cst_19 = arith.constant 1.000000e+00 : f32
    %28 = vector.broadcast %cst_19 : f32 to vector<1x32xf32>
    %29 = arith.subf %27, %28 : vector<1x32xf32>
    %30 = vector.extract_strided_slice %22 {offsets = [0, 96], sizes = [1, 32], strides = [1, 1]} : vector<1x128xf32> to vector<1x32xf32>
    %31 = arith.mulf %24, %14 : vector<1x32xf32>
    %32 = arith.mulf %23, %29 : vector<1x32xf32>
    %33 = arith.addf %31, %32 : vector<1x32xf32>
    %34 = math.tanh %33 : vector<1x32xf32>
    %35 = arith.mulf %30, %34 : vector<1x32xf32>
    %c0_20 = arith.constant 0 : index
    %c0_21 = arith.constant 0 : index
    %36 = vector.load %arg14[%c0_20, %c0_21] : memref<8x32xf32, #tpu.memory_space<vmem>>, vector<1x32xf32>
    tpu.vector_store %arg14[%c0_20, %c0_21], %35 {strides = array<i32>} : memref<8x32xf32, #tpu.memory_space<vmem>>, vector<1x32xf32>,
    %37 = vector.extract_strided_slice %11 {offsets = [1, 0], sizes = [1, 128], strides = [1, 1]} : vector<8x128xf32> to vector<1x128xf32>
    %cst_22 = arith.constant dense<0.000000e+00> : vector<1x128xf32>
    %38 = tpu.matmul %35, %12, %cst_22 {dimension_numbers = #tpu.dot_dimension_numbers<[1], [0], [0], [1], [0, 0, 1, 1], [], []>} : vector<1x32xf32>, vector<32x128xf32>, vector<1x128xf32> -> vector<1x128xf32>
    %39 = arith.addf %37, %38 : vector<1x128xf32>
    %40 = arith.negf %39 : vector<1x128xf32>
    %41 = math.exp %40 : vector<1x128xf32>
    %cst_23 = arith.constant 1.000000e+00 : f32
    %42 = vector.broadcast %cst_23 : f32 to vector<1x128xf32>
    %43 = arith.addf %42, %41 : vector<1x128xf32>
    %44 = arith.divf %42, %43 : vector<1x128xf32>
    %45 = vector.extract_strided_slice %44 {offsets = [0, 0], sizes = [1, 32], strides = [1, 1]} : vector<1x128xf32> to vector<1x32xf32>
    %46 = vector.extract_strided_slice %44 {offsets = [0, 32], sizes = [1, 32], strides = [1, 1]} : vector<1x128xf32> to vector<1x32xf32>
    %47 = vector.extract_strided_slice %44 {offsets = [0, 64], sizes = [1, 32], strides = [1, 1]} : vector<1x128xf32> to vector<1x32xf32>
    %cst_24 = arith.constant 2.000000e+00 : f32
    %48 = vector.broadcast %cst_24 : f32 to vector<1x32xf32>
    %49 = arith.mulf %48, %47 : vector<1x32xf32>
    %cst_25 = arith.constant 1.000000e+00 : f32
    %50 = vector.broadcast %cst_25 : f32 to vector<1x32xf32>
    %51 = arith.subf %49, %50 : vector<1x32xf32>
    %52 = vector.extract_strided_slice %44 {offsets = [0, 96], sizes = [1, 32], strides = [1, 1]} : vector<1x128xf32> to vector<1x32xf32>
    %53 = arith.mulf %46, %33 : vector<1x32xf32>
    %54 = arith.mulf %45, %51 : vector<1x32xf32>
    %55 = arith.addf %53, %54 : vector<1x32xf32>
    %56 = math.tanh %55 : vector<1x32xf32>
    %57 = arith.mulf %52, %56 : vector<1x32xf32>
    %c1 = arith.constant 1 : index
    %c0_26 = arith.constant 0 : index
    %58 = vector.load %arg14[%c1, %c0_26] : memref<8x32xf32, #tpu.memory_space<vmem>>, vector<1x32xf32>
    tpu.vector_store %arg14[%c1, %c0_26], %57 {strides = array<i32>} : memref<8x32xf32, #tpu.memory_space<vmem>>, vector<1x32xf32>,
    %59 = vector.extract_strided_slice %11 {offsets = [2, 0], sizes = [1, 128], strides = [1, 1]} : vector<8x128xf32> to vector<1x128xf32>
    %cst_27 = arith.constant dense<0.000000e+00> : vector<1x128xf32>
    %60 = tpu.matmul %57, %12, %cst_27 {dimension_numbers = #tpu.dot_dimension_numbers<[1], [0], [0], [1], [0, 0, 1, 1], [], []>} : vector<1x32xf32>, vector<32x128xf32>, vector<1x128xf32> -> vector<1x128xf32>
    %61 = arith.addf %59, %60 : vector<1x128xf32>
    %62 = arith.negf %61 : vector<1x128xf32>
    %63 = math.exp %62 : vector<1x128xf32>
    %cst_28 = arith.constant 1.000000e+00 : f32
    %64 = vector.broadcast %cst_28 : f32 to vector<1x128xf32>
    %65 = arith.addf %64, %63 : vector<1x128xf32>
    %66 = arith.divf %64, %65 : vector<1x128xf32>
    %67 = vector.extract_strided_slice %66 {offsets = [0, 0], sizes = [1, 32], strides = [1, 1]} : vector<1x128xf32> to vector<1x32xf32>
    %68 = vector.extract_strided_slice %66 {offsets = [0, 32], sizes = [1, 32], strides = [1, 1]} : vector<1x128xf32> to vector<1x32xf32>
    %69 = vector.extract_strided_slice %66 {offsets = [0, 64], sizes = [1, 32], strides = [1, 1]} : vector<1x128xf32> to vector<1x32xf32>
    %cst_29 = arith.constant 2.000000e+00 : f32
    %70 = vector.broadcast %cst_29 : f32 to vector<1x32xf32>
    %71 = arith.mulf %70, %69 : vector<1x32xf32>
    %cst_30 = arith.constant 1.000000e+00 : f32
    %72 = vector.broadcast %cst_30 : f32 to vector<1x32xf32>
    %73 = arith.subf %71, %72 : vector<1x32xf32>
    %74 = vector.extract_strided_slice %66 {offsets = [0, 96], sizes = [1, 32], strides = [1, 1]} : vector<1x128xf32> to vector<1x32xf32>
    %75 = arith.mulf %68, %55 : vector<1x32xf32>
    %76 = arith.mulf %67, %73 : vector<1x32xf32>
    %77 = arith.addf %75, %76 : vector<1x32xf32>
    %78 = math.tanh %77 : vector<1x32xf32>
    %79 = arith.mulf %74, %78 : vector<1x32xf32>
    %c2 = arith.constant 2 : index
    %c0_31 = arith.constant 0 : index
    %80 = vector.load %arg14[%c2, %c0_31] : memref<8x32xf32, #tpu.memory_space<vmem>>, vector<1x32xf32>
    tpu.vector_store %arg14[%c2, %c0_31], %79 {strides = array<i32>} : memref<8x32xf32, #tpu.memory_space<vmem>>, vector<1x32xf32>,
    %81 = vector.extract_strided_slice %11 {offsets = [3, 0], sizes = [1, 128], strides = [1, 1]} : vector<8x128xf32> to vector<1x128xf32>
    %cst_32 = arith.constant dense<0.000000e+00> : vector<1x128xf32>
    %82 = tpu.matmul %79, %12, %cst_32 {dimension_numbers = #tpu.dot_dimension_numbers<[1], [0], [0], [1], [0, 0, 1, 1], [], []>} : vector<1x32xf32>, vector<32x128xf32>, vector<1x128xf32> -> vector<1x128xf32>
    %83 = arith.addf %81, %82 : vector<1x128xf32>
    %84 = arith.negf %83 : vector<1x128xf32>
    %85 = math.exp %84 : vector<1x128xf32>
    %cst_33 = arith.constant 1.000000e+00 : f32
    %86 = vector.broadcast %cst_33 : f32 to vector<1x128xf32>
    %87 = arith.addf %86, %85 : vector<1x128xf32>
    %88 = arith.divf %86, %87 : vector<1x128xf32>
    %89 = vector.extract_strided_slice %88 {offsets = [0, 0], sizes = [1, 32], strides = [1, 1]} : vector<1x128xf32> to vector<1x32xf32>
    %90 = vector.extract_strided_slice %88 {offsets = [0, 32], sizes = [1, 32], strides = [1, 1]} : vector<1x128xf32> to vector<1x32xf32>
    %91 = vector.extract_strided_slice %88 {offsets = [0, 64], sizes = [1, 32], strides = [1, 1]} : vector<1x128xf32> to vector<1x32xf32>
    %cst_34 = arith.constant 2.000000e+00 : f32
    %92 = vector.broadcast %cst_34 : f32 to vector<1x32xf32>
    %93 = arith.mulf %92, %91 : vector<1x32xf32>
    %cst_35 = arith.constant 1.000000e+00 : f32
    %94 = vector.broadcast %cst_35 : f32 to vector<1x32xf32>
    %95 = arith.subf %93, %94 : vector<1x32xf32>
    %96 = vector.extract_strided_slice %88 {offsets = [0, 96], sizes = [1, 32], strides = [1, 1]} : vector<1x128xf32> to vector<1x32xf32>
    %97 = arith.mulf %90, %77 : vector<1x32xf32>
    %98 = arith.mulf %89, %95 : vector<1x32xf32>
    %99 = arith.addf %97, %98 : vector<1x32xf32>
    %100 = math.tanh %99 : vector<1x32xf32>
    %101 = arith.mulf %96, %100 : vector<1x32xf32>
    %c3 = arith.constant 3 : index
    %c0_36 = arith.constant 0 : index
    %102 = vector.load %arg14[%c3, %c0_36] : memref<8x32xf32, #tpu.memory_space<vmem>>, vector<1x32xf32>
    tpu.vector_store %arg14[%c3, %c0_36], %101 {strides = array<i32>} : memref<8x32xf32, #tpu.memory_space<vmem>>, vector<1x32xf32>,
    %103 = vector.extract_strided_slice %11 {offsets = [4, 0], sizes = [1, 128], strides = [1, 1]} : vector<8x128xf32> to vector<1x128xf32>
    %cst_37 = arith.constant dense<0.000000e+00> : vector<1x128xf32>
    %104 = tpu.matmul %101, %12, %cst_37 {dimension_numbers = #tpu.dot_dimension_numbers<[1], [0], [0], [1], [0, 0, 1, 1], [], []>} : vector<1x32xf32>, vector<32x128xf32>, vector<1x128xf32> -> vector<1x128xf32>
    %105 = arith.addf %103, %104 : vector<1x128xf32>
    %106 = arith.negf %105 : vector<1x128xf32>
    %107 = math.exp %106 : vector<1x128xf32>
    %cst_38 = arith.constant 1.000000e+00 : f32
    %108 = vector.broadcast %cst_38 : f32 to vector<1x128xf32>
    %109 = arith.addf %108, %107 : vector<1x128xf32>
    %110 = arith.divf %108, %109 : vector<1x128xf32>
    %111 = vector.extract_strided_slice %110 {offsets = [0, 0], sizes = [1, 32], strides = [1, 1]} : vector<1x128xf32> to vector<1x32xf32>
    %112 = vector.extract_strided_slice %110 {offsets = [0, 32], sizes = [1, 32], strides = [1, 1]} : vector<1x128xf32> to vector<1x32xf32>
    %113 = vector.extract_strided_slice %110 {offsets = [0, 64], sizes = [1, 32], strides = [1, 1]} : vector<1x128xf32> to vector<1x32xf32>
    %cst_39 = arith.constant 2.000000e+00 : f32
    %114 = vector.broadcast %cst_39 : f32 to vector<1x32xf32>
    %115 = arith.mulf %114, %113 : vector<1x32xf32>
    %cst_40 = arith.constant 1.000000e+00 : f32
    %116 = vector.broadcast %cst_40 : f32 to vector<1x32xf32>
    %117 = arith.subf %115, %116 : vector<1x32xf32>
    %118 = vector.extract_strided_slice %110 {offsets = [0, 96], sizes = [1, 32], strides = [1, 1]} : vector<1x128xf32> to vector<1x32xf32>
    %119 = arith.mulf %112, %99 : vector<1x32xf32>
    %120 = arith.mulf %111, %117 : vector<1x32xf32>
    %121 = arith.addf %119, %120 : vector<1x32xf32>
    %122 = math.tanh %121 : vector<1x32xf32>
    %123 = arith.mulf %118, %122 : vector<1x32xf32>
    %c4 = arith.constant 4 : index
    %c0_41 = arith.constant 0 : index
    %124 = vector.load %arg14[%c4, %c0_41] : memref<8x32xf32, #tpu.memory_space<vmem>>, vector<1x32xf32>
    tpu.vector_store %arg14[%c4, %c0_41], %123 {strides = array<i32>} : memref<8x32xf32, #tpu.memory_space<vmem>>, vector<1x32xf32>,
    %125 = vector.extract_strided_slice %11 {offsets = [5, 0], sizes = [1, 128], strides = [1, 1]} : vector<8x128xf32> to vector<1x128xf32>
    %cst_42 = arith.constant dense<0.000000e+00> : vector<1x128xf32>
    %126 = tpu.matmul %123, %12, %cst_42 {dimension_numbers = #tpu.dot_dimension_numbers<[1], [0], [0], [1], [0, 0, 1, 1], [], []>} : vector<1x32xf32>, vector<32x128xf32>, vector<1x128xf32> -> vector<1x128xf32>
    %127 = arith.addf %125, %126 : vector<1x128xf32>
    %128 = arith.negf %127 : vector<1x128xf32>
    %129 = math.exp %128 : vector<1x128xf32>
    %cst_43 = arith.constant 1.000000e+00 : f32
    %130 = vector.broadcast %cst_43 : f32 to vector<1x128xf32>
    %131 = arith.addf %130, %129 : vector<1x128xf32>
    %132 = arith.divf %130, %131 : vector<1x128xf32>
    %133 = vector.extract_strided_slice %132 {offsets = [0, 0], sizes = [1, 32], strides = [1, 1]} : vector<1x128xf32> to vector<1x32xf32>
    %134 = vector.extract_strided_slice %132 {offsets = [0, 32], sizes = [1, 32], strides = [1, 1]} : vector<1x128xf32> to vector<1x32xf32>
    %135 = vector.extract_strided_slice %132 {offsets = [0, 64], sizes = [1, 32], strides = [1, 1]} : vector<1x128xf32> to vector<1x32xf32>
    %cst_44 = arith.constant 2.000000e+00 : f32
    %136 = vector.broadcast %cst_44 : f32 to vector<1x32xf32>
    %137 = arith.mulf %136, %135 : vector<1x32xf32>
    %cst_45 = arith.constant 1.000000e+00 : f32
    %138 = vector.broadcast %cst_45 : f32 to vector<1x32xf32>
    %139 = arith.subf %137, %138 : vector<1x32xf32>
    %140 = vector.extract_strided_slice %132 {offsets = [0, 96], sizes = [1, 32], strides = [1, 1]} : vector<1x128xf32> to vector<1x32xf32>
    %141 = arith.mulf %134, %121 : vector<1x32xf32>
    %142 = arith.mulf %133, %139 : vector<1x32xf32>
    %143 = arith.addf %141, %142 : vector<1x32xf32>
    %144 = math.tanh %143 : vector<1x32xf32>
    %145 = arith.mulf %140, %144 : vector<1x32xf32>
    %c5 = arith.constant 5 : index
    %c0_46 = arith.constant 0 : index
    %146 = vector.load %arg14[%c5, %c0_46] : memref<8x32xf32, #tpu.memory_space<vmem>>, vector<1x32xf32>
    tpu.vector_store %arg14[%c5, %c0_46], %145 {strides = array<i32>} : memref<8x32xf32, #tpu.memory_space<vmem>>, vector<1x32xf32>,
    %147 = vector.extract_strided_slice %11 {offsets = [6, 0], sizes = [1, 128], strides = [1, 1]} : vector<8x128xf32> to vector<1x128xf32>
    %cst_47 = arith.constant dense<0.000000e+00> : vector<1x128xf32>
    %148 = tpu.matmul %145, %12, %cst_47 {dimension_numbers = #tpu.dot_dimension_numbers<[1], [0], [0], [1], [0, 0, 1, 1], [], []>} : vector<1x32xf32>, vector<32x128xf32>, vector<1x128xf32> -> vector<1x128xf32>
    %149 = arith.addf %147, %148 : vector<1x128xf32>
    %150 = arith.negf %149 : vector<1x128xf32>
    %151 = math.exp %150 : vector<1x128xf32>
    %cst_48 = arith.constant 1.000000e+00 : f32
    %152 = vector.broadcast %cst_48 : f32 to vector<1x128xf32>
    %153 = arith.addf %152, %151 : vector<1x128xf32>
    %154 = arith.divf %152, %153 : vector<1x128xf32>
    %155 = vector.extract_strided_slice %154 {offsets = [0, 0], sizes = [1, 32], strides = [1, 1]} : vector<1x128xf32> to vector<1x32xf32>
    %156 = vector.extract_strided_slice %154 {offsets = [0, 32], sizes = [1, 32], strides = [1, 1]} : vector<1x128xf32> to vector<1x32xf32>
    %157 = vector.extract_strided_slice %154 {offsets = [0, 64], sizes = [1, 32], strides = [1, 1]} : vector<1x128xf32> to vector<1x32xf32>
    %cst_49 = arith.constant 2.000000e+00 : f32
    %158 = vector.broadcast %cst_49 : f32 to vector<1x32xf32>
    %159 = arith.mulf %158, %157 : vector<1x32xf32>
    %cst_50 = arith.constant 1.000000e+00 : f32
    %160 = vector.broadcast %cst_50 : f32 to vector<1x32xf32>
    %161 = arith.subf %159, %160 : vector<1x32xf32>
    %162 = vector.extract_strided_slice %154 {offsets = [0, 96], sizes = [1, 32], strides = [1, 1]} : vector<1x128xf32> to vector<1x32xf32>
    %163 = arith.mulf %156, %143 : vector<1x32xf32>
    %164 = arith.mulf %155, %161 : vector<1x32xf32>
    %165 = arith.addf %163, %164 : vector<1x32xf32>
    %166 = math.tanh %165 : vector<1x32xf32>
    %167 = arith.mulf %162, %166 : vector<1x32xf32>
    %c6 = arith.constant 6 : index
    %c0_51 = arith.constant 0 : index
    %168 = vector.load %arg14[%c6, %c0_51] : memref<8x32xf32, #tpu.memory_space<vmem>>, vector<1x32xf32>
    tpu.vector_store %arg14[%c6, %c0_51], %167 {strides = array<i32>} : memref<8x32xf32, #tpu.memory_space<vmem>>, vector<1x32xf32>,
    %169 = vector.extract_strided_slice %11 {offsets = [7, 0], sizes = [1, 128], strides = [1, 1]} : vector<8x128xf32> to vector<1x128xf32>
    %cst_52 = arith.constant dense<0.000000e+00> : vector<1x128xf32>
    %170 = tpu.matmul %167, %12, %cst_52 {dimension_numbers = #tpu.dot_dimension_numbers<[1], [0], [0], [1], [0, 0, 1, 1], [], []>} : vector<1x32xf32>, vector<32x128xf32>, vector<1x128xf32> -> vector<1x128xf32>
    %171 = arith.addf %169, %170 : vector<1x128xf32>
    %172 = arith.negf %171 : vector<1x128xf32>
    %173 = math.exp %172 : vector<1x128xf32>
    %cst_53 = arith.constant 1.000000e+00 : f32
    %174 = vector.broadcast %cst_53 : f32 to vector<1x128xf32>
    %175 = arith.addf %174, %173 : vector<1x128xf32>
    %176 = arith.divf %174, %175 : vector<1x128xf32>
    %177 = vector.extract_strided_slice %176 {offsets = [0, 0], sizes = [1, 32], strides = [1, 1]} : vector<1x128xf32> to vector<1x32xf32>
    %178 = vector.extract_strided_slice %176 {offsets = [0, 32], sizes = [1, 32], strides = [1, 1]} : vector<1x128xf32> to vector<1x32xf32>
    %179 = vector.extract_strided_slice %176 {offsets = [0, 64], sizes = [1, 32], strides = [1, 1]} : vector<1x128xf32> to vector<1x32xf32>
    %cst_54 = arith.constant 2.000000e+00 : f32
    %180 = vector.broadcast %cst_54 : f32 to vector<1x32xf32>
    %181 = arith.mulf %180, %179 : vector<1x32xf32>
    %cst_55 = arith.constant 1.000000e+00 : f32
    %182 = vector.broadcast %cst_55 : f32 to vector<1x32xf32>
    %183 = arith.subf %181, %182 : vector<1x32xf32>
    %184 = vector.extract_strided_slice %176 {offsets = [0, 96], sizes = [1, 32], strides = [1, 1]} : vector<1x128xf32> to vector<1x32xf32>
    %185 = arith.mulf %178, %165 : vector<1x32xf32>
    %186 = arith.mulf %177, %183 : vector<1x32xf32>
    %187 = arith.addf %185, %186 : vector<1x32xf32>
    %188 = math.tanh %187 : vector<1x32xf32>
    %189 = arith.mulf %184, %188 : vector<1x32xf32>
    %c7 = arith.constant 7 : index
    %c0_56 = arith.constant 0 : index
    %190 = vector.load %arg14[%c7, %c0_56] : memref<8x32xf32, #tpu.memory_space<vmem>>, vector<1x32xf32>
    tpu.vector_store %arg14[%c7, %c0_56], %189 {strides = array<i32>} : memref<8x32xf32, #tpu.memory_space<vmem>>, vector<1x32xf32>,
    %c0_57 = arith.constant 0 : index
    %c0_58 = arith.constant 0 : index
    %191 = vector.load %arg14[%c0_57, %c0_58] : memref<8x32xf32, #tpu.memory_space<vmem>>, vector<8x32xf32>
    %192 = vector.extract_strided_slice %191 {offsets = [0, 0], sizes = [8, 16], strides = [1, 1]} : vector<8x32xf32> to vector<8x16xf32>
    %193 = vector.extract_strided_slice %191 {offsets = [0, 16], sizes = [8, 16], strides = [1, 1]} : vector<8x32xf32> to vector<8x16xf32>
    %cst_59 = arith.constant dense<0.000000e+00> : vector<8x16xf32>
    %194 = tpu.matmul %2, %193, %cst_59 {dimension_numbers = #tpu.dot_dimension_numbers<[1], [0], [0], [1], [0, 0, 1, 1], [], []>} : vector<8x8xf32>, vector<8x16xf32>, vector<8x16xf32> -> vector<8x16xf32>
    %c0_60 = arith.constant 0 : index
    %c0_61 = arith.constant 0 : index
    %195 = vector.load %arg7[%c0_60, %c0_61] : memref<16x768xf32, #tpu.memory_space<vmem>>, vector<16x768xf32>
    %cst_62 = arith.constant dense<0.000000e+00> : vector<8x768xf32>
    %196 = tpu.matmul %192, %195, %cst_62 {dimension_numbers = #tpu.dot_dimension_numbers<[1], [0], [0], [1], [0, 0, 1, 1], [], []>} : vector<8x16xf32>, vector<16x768xf32>, vector<8x768xf32> -> vector<8x768xf32>
    %c0_63 = arith.constant 0 : index
    %c0_64 = arith.constant 0 : index
    %197 = vector.load %arg8[%c0_63, %c0_64] : memref<16x768xf32, #tpu.memory_space<vmem>>, vector<16x768xf32>
    %cst_65 = arith.constant dense<0.000000e+00> : vector<8x768xf32>
    %198 = tpu.matmul %194, %197, %cst_65 {dimension_numbers = #tpu.dot_dimension_numbers<[1], [0], [0], [1], [0, 0, 1, 1], [], []>} : vector<8x16xf32>, vector<16x768xf32>, vector<8x768xf32> -> vector<8x768xf32>
    %199 = arith.addf %196, %198 : vector<8x768xf32>
    %c0_66 = arith.constant 0 : index
    %c0_67 = arith.constant 0 : index
    %200 = vector.load %arg9[%c0_66, %c0_67] : memref<1x768xf32, #tpu.memory_space<vmem>>, vector<1x768xf32>
    %201 = vector.broadcast %200 : vector<1x768xf32> to vector<8x768xf32>
    %202 = arith.addf %199, %201 : vector<8x768xf32>
    %c0_68 = arith.constant 0 : index
    %c0_69 = arith.constant 0 : index
    %203 = vector.load %arg10[%c0_68, %c0_69] : memref<8x64xf32, #tpu.memory_space<vmem>>, vector<8x64xf32>
    %c0_70 = arith.constant 0 : index
    %c0_71 = arith.constant 0 : index
    %204 = vector.load %arg11[%c0_70, %c0_71] : memref<8x64xf32, #tpu.memory_space<vmem>>, vector<8x64xf32>
    %c0_72 = arith.constant 0 : index
    %c0_73 = arith.constant 0 : index
    %c0_74 = arith.constant 0 : index
    %205 = vector.load %arg2[%c0_72, %c0_73, %c0_74] : memref<1x1x8xf32, #tpu.memory_space<vmem>>, vector<1x1x8xf32>
    %206 = vector.shape_cast %205 : vector<1x1x8xf32> to vector<1x8xf32>
    %207 = vector.shape_cast %206 : vector<1x8xf32> to vector<1x8xf32>
    %208 = vector.broadcast %207 : vector<1x8xf32> to vector<8x8xf32>
    %209 = tpu.iota {dimensions = array<i32: 0>} : vector<8x8xi32>
    %210 = tpu.iota {dimensions = array<i32: 1>} : vector<8x8xi32>
    %211 = arith.cmpi sgt, %209, %210 : vector<8x8xi32>
    %212 = arith.extui %211 : vector<8x8xi1> to vector<8x8xi32>
    %213 = arith.sitofp %212 : vector<8x8xi32> to vector<8x8xf32>
    %cst_75 = arith.constant 1.250000e-01 : f32
    %214 = vector.broadcast %cst_75 : f32 to vector<8x8xf32>
    %215 = arith.mulf %208, %214 : vector<8x8xf32>
    %cst_76 = arith.constant 1.000000e+00 : f32
    %216 = vector.broadcast %cst_76 : f32 to vector<8x8xf32>
    %217 = arith.subf %216, %208 : vector<8x8xf32>
    %218 = arith.addf %217, %213 : vector<8x8xf32>
    %cst_77 = arith.constant 1.250000e+11 : f32
    %219 = vector.broadcast %cst_77 : f32 to vector<8x8xf32>
    %220 = arith.mulf %218, %219 : vector<8x8xf32>
    %221 = vector.extract_strided_slice %202 {offsets = [0, 0], sizes = [8, 64], strides = [1, 1]} : vector<8x768xf32> to vector<8x64xf32>
    %222 = vector.extract_strided_slice %202 {offsets = [0, 64], sizes = [8, 64], strides = [1, 1]} : vector<8x768xf32> to vector<8x64xf32>
    %223 = vector.extract_strided_slice %202 {offsets = [0, 384], sizes = [8, 64], strides = [1, 1]} : vector<8x768xf32> to vector<8x64xf32>
    %224 = vector.extract_strided_slice %202 {offsets = [0, 448], sizes = [8, 64], strides = [1, 1]} : vector<8x768xf32> to vector<8x64xf32>
    %225 = arith.mulf %221, %203 : vector<8x64xf32>
    %226 = arith.mulf %223, %204 : vector<8x64xf32>
    %227 = arith.addf %225, %226 : vector<8x64xf32>
    %228 = arith.mulf %222, %203 : vector<8x64xf32>
    %229 = arith.mulf %224, %204 : vector<8x64xf32>
    %230 = arith.addf %228, %229 : vector<8x64xf32>
    %231 = tpu.transpose %230, [1, 0] : vector<8x64xf32> -> vector<64x8xf32>
    %cst_78 = arith.constant dense<0.000000e+00> : vector<8x8xf32>
    %232 = tpu.matmul %227, %231, %cst_78 {dimension_numbers = #tpu.dot_dimension_numbers<[1], [0], [0], [1], [0, 0, 1, 1], [], []>} : vector<8x64xf32>, vector<64x8xf32>, vector<8x8xf32> -> vector<8x8xf32>
    %233 = arith.mulf %232, %215 : vector<8x8xf32>
    %234 = arith.subf %233, %220 : vector<8x8xf32>
    %c0_79 = arith.constant 0 : index
    %c0_80 = arith.constant 0 : index
    %c0_81 = arith.constant 0 : index
    %c0_82 = arith.constant 0 : index
    %235 = vector.load %arg13[%c0_79, %c0_80, %c0_81, %c0_82] : memref<1x3x8x8xf32, #tpu.memory_space<vmem>>, vector<1x1x8x8xf32>
    %236 = vector.shape_cast %235 : vector<1x1x8x8xf32> to vector<8x8xf32>
    %237 = vector.shape_cast %234 : vector<8x8xf32> to vector<1x1x8x8xf32>
    tpu.vector_store %arg13[%c0_79, %c0_80, %c0_81, %c0_82], %237 {strides = array<i32>} : memref<1x3x8x8xf32, #tpu.memory_space<vmem>>, vector<1x1x8x8xf32>,
    %238 = vector.extract_strided_slice %202 {offsets = [0, 128], sizes = [8, 64], strides = [1, 1]} : vector<8x768xf32> to vector<8x64xf32>
    %239 = vector.extract_strided_slice %202 {offsets = [0, 192], sizes = [8, 64], strides = [1, 1]} : vector<8x768xf32> to vector<8x64xf32>
    %240 = vector.extract_strided_slice %202 {offsets = [0, 512], sizes = [8, 64], strides = [1, 1]} : vector<8x768xf32> to vector<8x64xf32>
    %241 = vector.extract_strided_slice %202 {offsets = [0, 576], sizes = [8, 64], strides = [1, 1]} : vector<8x768xf32> to vector<8x64xf32>
    %242 = arith.mulf %238, %203 : vector<8x64xf32>
    %243 = arith.mulf %240, %204 : vector<8x64xf32>
    %244 = arith.addf %242, %243 : vector<8x64xf32>
    %245 = arith.mulf %239, %203 : vector<8x64xf32>
    %246 = arith.mulf %241, %204 : vector<8x64xf32>
    %247 = arith.addf %245, %246 : vector<8x64xf32>
    %248 = tpu.transpose %247, [1, 0] : vector<8x64xf32> -> vector<64x8xf32>
    %cst_83 = arith.constant dense<0.000000e+00> : vector<8x8xf32>
    %249 = tpu.matmul %244, %248, %cst_83 {dimension_numbers = #tpu.dot_dimension_numbers<[1], [0], [0], [1], [0, 0, 1, 1], [], []>} : vector<8x64xf32>, vector<64x8xf32>, vector<8x8xf32> -> vector<8x8xf32>
    %250 = arith.mulf %249, %215 : vector<8x8xf32>
    %251 = arith.subf %250, %220 : vector<8x8xf32>
    %c0_84 = arith.constant 0 : index
    %c1_85 = arith.constant 1 : index
    %c0_86 = arith.constant 0 : index
    %c0_87 = arith.constant 0 : index
    %252 = vector.load %arg13[%c0_84, %c1_85, %c0_86, %c0_87] : memref<1x3x8x8xf32, #tpu.memory_space<vmem>>, vector<1x1x8x8xf32>
    %253 = vector.shape_cast %252 : vector<1x1x8x8xf32> to vector<8x8xf32>
    %254 = vector.shape_cast %251 : vector<8x8xf32> to vector<1x1x8x8xf32>
    tpu.vector_store %arg13[%c0_84, %c1_85, %c0_86, %c0_87], %254 {strides = array<i32>} : memref<1x3x8x8xf32, #tpu.memory_space<vmem>>, vector<1x1x8x8xf32>,
    %255 = vector.extract_strided_slice %202 {offsets = [0, 256], sizes = [8, 64], strides = [1, 1]} : vector<8x768xf32> to vector<8x64xf32>
    %256 = vector.extract_strided_slice %202 {offsets = [0, 320], sizes = [8, 64], strides = [1, 1]} : vector<8x768xf32> to vector<8x64xf32>
    %257 = vector.extract_strided_slice %202 {offsets = [0, 640], sizes = [8, 64], strides = [1, 1]} : vector<8x768xf32> to vector<8x64xf32>
    %258 = vector.extract_strided_slice %202 {offsets = [0, 704], sizes = [8, 64], strides = [1, 1]} : vector<8x768xf32> to vector<8x64xf32>
    %259 = arith.mulf %255, %203 : vector<8x64xf32>
    %260 = arith.mulf %257, %204 : vector<8x64xf32>
    %261 = arith.addf %259, %260 : vector<8x64xf32>
    %262 = arith.mulf %256, %203 : vector<8x64xf32>
    %263 = arith.mulf %258, %204 : vector<8x64xf32>
    %264 = arith.addf %262, %263 : vector<8x64xf32>
    %265 = tpu.transpose %264, [1, 0] : vector<8x64xf32> -> vector<64x8xf32>
    %cst_88 = arith.constant dense<0.000000e+00> : vector<8x8xf32>
    %266 = tpu.matmul %261, %265, %cst_88 {dimension_numbers = #tpu.dot_dimension_numbers<[1], [0], [0], [1], [0, 0, 1, 1], [], []>} : vector<8x64xf32>, vector<64x8xf32>, vector<8x8xf32> -> vector<8x8xf32>
    %267 = arith.mulf %266, %215 : vector<8x8xf32>
    %268 = arith.subf %267, %220 : vector<8x8xf32>
    %c0_89 = arith.constant 0 : index
    %c2_90 = arith.constant 2 : index
    %c0_91 = arith.constant 0 : index
    %c0_92 = arith.constant 0 : index
    %269 = vector.load %arg13[%c0_89, %c2_90, %c0_91, %c0_92] : memref<1x3x8x8xf32, #tpu.memory_space<vmem>>, vector<1x1x8x8xf32>
    %270 = vector.shape_cast %269 : vector<1x1x8x8xf32> to vector<8x8xf32>
    %271 = vector.shape_cast %268 : vector<8x8xf32> to vector<1x1x8x8xf32>
    tpu.vector_store %arg13[%c0_89, %c2_90, %c0_91, %c0_92], %271 {strides = array<i32>} : memref<1x3x8x8xf32, #tpu.memory_space<vmem>>, vector<1x1x8x8xf32>,
    return
  }
  func.func @transform_0(%arg0: i32) -> (i32, i32, i32) {
    %c0_i32 = arith.constant 0 : i32
    %c0_i32_0 = arith.constant 0 : i32
    %c0_i32_1 = arith.constant 0 : i32
    return %arg0, %c0_i32, %c0_i32_0 : i32, i32, i32
  }
  func.func @transform_1(%arg0: i32) -> (i32, i32, i32) {
    %c0_i32 = arith.constant 0 : i32
    %c0_i32_0 = arith.constant 0 : i32
    %c0_i32_1 = arith.constant 0 : i32
    return %arg0, %c0_i32, %c0_i32_0 : i32, i32, i32
  }
  func.func @transform_2(%arg0: i32) -> (i32, i32) {
    %c0_i32 = arith.constant 0 : i32
    %c0_i32_0 = arith.constant 0 : i32
    %c0_i32_1 = arith.constant 0 : i32
    return %c0_i32, %c0_i32_0 : i32, i32
  }
  func.func @transform_3(%arg0: i32) -> (i32, i32) {
    %c0_i32 = arith.constant 0 : i32
    %c0_i32_0 = arith.constant 0 : i32
    %c0_i32_1 = arith.constant 0 : i32
    return %c0_i32, %c0_i32_0 : i32, i32
  }
  func.func @transform_4(%arg0: i32) -> (i32, i32) {
    %c0_i32 = arith.constant 0 : i32
    %c0_i32_0 = arith.constant 0 : i32
    %c0_i32_1 = arith.constant 0 : i32
    return %c0_i32, %c0_i32_0 : i32, i32
  }
  func.func @transform_5(%arg0: i32) -> (i32, i32) {
    %c0_i32 = arith.constant 0 : i32
    %c0_i32_0 = arith.constant 0 : i32
    %c0_i32_1 = arith.constant 0 : i32
    return %c0_i32, %c0_i32_0 : i32, i32
  }
  func.func @transform_6(%arg0: i32) -> (i32, i32) {
    %c0_i32 = arith.constant 0 : i32
    %c0_i32_0 = arith.constant 0 : i32
    %c0_i32_1 = arith.constant 0 : i32
    return %c0_i32, %c0_i32_0 : i32, i32
  }
  func.func @transform_7(%arg0: i32) -> (i32, i32) {
    %c0_i32 = arith.constant 0 : i32
    %c0_i32_0 = arith.constant 0 : i32
    %c0_i32_1 = arith.constant 0 : i32
    return %c0_i32, %c0_i32_0 : i32, i32
  }
  func.func @transform_8(%arg0: i32) -> (i32, i32) {
    %c0_i32 = arith.constant 0 : i32
    %c0_i32_0 = arith.constant 0 : i32
    %c0_i32_1 = arith.constant 0 : i32
    return %c0_i32, %c0_i32_0 : i32, i32
  }
  func.func @transform_9(%arg0: i32) -> (i32, i32) {
    %c0_i32 = arith.constant 0 : i32
    %c0_i32_0 = arith.constant 0 : i32
    %c0_i32_1 = arith.constant 0 : i32
    return %c0_i32, %c0_i32_0 : i32, i32
  }
  func.func @transform_10(%arg0: i32) -> (i32, i32) {
    %c0_i32 = arith.constant 0 : i32
    %c0_i32_0 = arith.constant 0 : i32
    %c0_i32_1 = arith.constant 0 : i32
    return %c0_i32, %c0_i32_0 : i32, i32
  }
  func.func @transform_11(%arg0: i32) -> (i32, i32) {
    %c0_i32 = arith.constant 0 : i32
    %c0_i32_0 = arith.constant 0 : i32
    %c0_i32_1 = arith.constant 0 : i32
    return %c0_i32, %c0_i32_0 : i32, i32
  }
  func.func @transform_12(%arg0: i32) -> (i32, i32, i32, i32) {
    %c0_i32 = arith.constant 0 : i32
    %c0_i32_0 = arith.constant 0 : i32
    %c0_i32_1 = arith.constant 0 : i32
    %c0_i32_2 = arith.constant 0 : i32
    return %arg0, %c0_i32, %c0_i32_0, %c0_i32_1 : i32, i32, i32, i32
  }
}

</mosaic_0001>

<bundles_post_ra>
// kernel: tpu_custom_call.1
= control target key start
LH: loop header
LB: loop body
LE: loop exit
PB: predicated region body
PF: predicated region fallthrough
CT: control target
= control target key end

     0   :  { %s4230_s0 = inlined_call_operand.hbm [shape: f32[2,8,32], index: 0, kind: input, shape index: {}]   ;;  %s4231_s1 = inlined_call_operand.hbm [shape: f32[2,1,8], index: 1, kind: input, shape index: {}]   ;;  %s4232_s2 = inlined_call_operand.hbm [shape: f32[32,128], index: 2, kind: input, shape index: {}]   ;;  %s4233_s3 = inlined_call_operand.hbm [shape: f32[32,128], index: 3, kind: input, shape index: {}]   ;;  %s4234_s4 = inlined_call_operand.hbm [shape: f32[32,128], index: 4, kind: input, shape index: {}]   ;;  %s4235_s5 = inlined_call_operand.hbm [shape: f32[1,128], index: 5, kind: input, shape index: {}]   ;;  %s4236_s6 = inlined_call_operand.hbm [shape: f32[16,768], index: 6, kind: input, shape index: {}]   ;;  %s4237_s7 = inlined_call_operand.hbm [shape: f32[16,768], index: 7, kind: input, shape index: {}]   ;;  %s4238_s8 = inlined_call_operand.vmem [shape: f32[1,768], index: 8, kind: input, shape index: {}]   ;;  %s4239_s9 = inlined_call_operand.vmem [shape: f32[8,64], index: 9, kind: input, shape index: {}]   ;;  %s4240_s10 = inlined_call_operand.vmem [shape: f32[8,64], index: 10, kind: input, shape index: {}]   ;;  %s4241_s11 = inlined_call_operand.vmem [shape: f32[8,8], index: 11, kind: input, shape index: {}]   ;;  %s4242_s12 = inlined_call_operand.hbm [shape: f32[2,3,8,8], index: 12, kind: output, shape index: {}]  }
   0x1   :  { %4249 = sst [smem:[#allocation25_spill]] %s4230_s0 }
   0x2   :  { %4250 = sst [smem:[#allocation26_spill]] %s4232_s2 }
   0x3   :  { %4251 = sst [smem:[#allocation27_spill]] %s4233_s3 }
   0x4   :  { %4252 = sst [smem:[#allocation28_spill]] %s4238_s8 }
   0x5   :  { %4253 = sst [smem:[#allocation29_spill]] %s4239_s9 }
   0x6   :  { %4254 = sst [smem:[#allocation30_spill]] %s4240_s10 }
   0x7   :  { %4255 = sst [smem:[#allocation31_spill]] %s4242_s12 }
   0x8   :  { %17 = vsyncpa [#allocation4], 0 }
   0x9   :  { %19 = vsyncpa [#allocation4 + $0x1], 0 }
   0xa   :  { %20 = vsyncpa [#allocation7], 0 }
   0xb   :  { %22 = vsyncpa [#allocation7 + $0x1], 0 }
   0xc   :  { %23 = vsyncpa [#allocation10], 0 }
   0xd   :  { %24 = vsyncpa [#allocation13], 0 }
   0xe   :  { %25 = vsyncpa [#allocation16], 0 }
   0xf   :  { %26 = vsyncpa [#allocation5], 0 }
  0x10   :  { %28 = vsyncpa [#allocation5 + $0x1], 0  ;;  %s3637_s21 = smov 0   ;;  %s3639_s22 = smov 0  }
  0x11   :  { %s3641_s23 = smov 0   ;;  %s3643_s24 = smov 0  }
  0x12 LB: > { %s3551_s25 = smov [#allocation8]   ;;  %s3658_s27 = sadd.s32 4294967295, %s3549_s24   ;;  %s3549_s24 = sphi %s3643_s24, %s4290_s24   ;;  %s3545_s23 = sphi %s3641_s23, %s4289_s23   ;;  %s3541_s22 = sphi %s3639_s22, %s4288_s22   ;;  %s3537_s21 = sphi %s3637_s21, %s4287_s21  }
  0x13   : > { %s339_s26 = sshll.u32 %s3551_s25, 4  ;;  %p2710_p0 = scmp.ge.s32.totalorder %s3549_s24, 1  ;;  %s3663_s26 = int_to_ptr.vmem [resolvable:$true] %s339_s26 }
  0x14   : > { %p4245_p1 = scmp.eq.s32.totalorder %s3658_s27, 0  ;;  %p327_p2 = scmp.lt.s32.totalorder %s3549_s24, 3 }
  0x15   : > { %s3552_s29 = smov [#allocation9]   ;;  %s3553_s14 = smov [#allocation12]  }
  0x16   : > { %p3665_p3 = pnand %p2710_p0, %p327_p2  ;;  %s352_s30 = sshll.u32 %s3552_s29, 4  ;;  %s3678_s30 = int_to_ptr.vmem [resolvable:$true] %s352_s30 }
  0x17   : > { %s379_s15 = sshll.u32 %s3553_s14, 4  ;;  %s4258_s2 = sld [smem:[#allocation26_spill]]  ;;  %s3680_s15 = int_to_ptr.vmem [resolvable:$true] %s379_s15 }
  0x18   : > { %s4256_s28 = scalar_select %p3665_p3, 1, 0 }
  0x19   : > { %p3093_p5 = pneg %p3665_p3 }
  0x1b   : > { %p3674_p6 = pnand %p3093_p5, %p4245_p1 }
  0x1d   : > { %s3235_s18 = scalar_lea.hbm %s4258_s2, 512  ;;  %p3690_p8 = pneg %p3674_p6 }
  0x1e   : > { %p3236_p7 = scmp.ne.s32.totalorder %s4258_s2, %s3235_s18  ;;  %p3242_p11 = scmp.lt.u32.totalorder %s3235_s18, %s4258_s2 }
  0x20   : > { %p3238_p9 = pnand %p3690_p8, %p3236_p7 }
  0x22   : > { %p3239_p10 = pneg %p3238_p9 }
  0x24   : > { %p3244_p12 = pnand %p3242_p11, %p3239_p10 }
  0x26   : > { %3247 = shalt.err (!%p3244_p12)
}
  0x27   : > { %s3248_s16 = scalar_lea.vmem %s3663_s26, 512  ;;  %p3256_p5 = scmp.lt.s32.totalorder %s3663_s26, %s3663_s26 }
  0x28   : > { %p3249_p13 = scmp.ne.s32.totalorder %s3663_s26, %s3248_s16  ;;  %p3257_p4 = scmp.lt.s32.totalorder %s3248_s16, %s3248_s16 }
  0x2a   : > { %p3251_p0 = pnand %p3249_p13, %p3690_p8  ;;  %p3258_p7 = por %p3257_p4, %p3256_p5 }
  0x2c   : > { %p3252_p2 = pneg %p3251_p0 }
  0x2e   : > { %p3259_p9 = pnand %p3258_p7, %p3252_p2 }
  0x30   : > { %3262 = shalt.err (!%p3259_p9)
}
  0x31   : > { %s4244_s17 = smov 128   ;;  %s3555_s18 = smov 8  }
  0x32   : > { %3096 = dma.hbm_to_vmem [thread:$0]  (!%p3674_p6), %s4258_s2, 512, %s3663_s26, [#allocation7], %s4244_s17, %s4244_s17, %s3555_s18  }
  0x33   : > { %s4260_s3 = sld [smem:[#allocation27_spill]] }
  0x39   : > { %s3263_s16 = scalar_lea.hbm %s4260_s3, 512 }
  0x3a   : > { %p3264_p4 = scmp.ne.s32.totalorder %s4260_s3, %s3263_s16  ;;  %p3270_p12 = scmp.lt.u32.totalorder %s3263_s16, %s4260_s3 }
  0x3c   : > { %p3266_p10 = pnand %p3264_p4, %p3690_p8 }
  0x3e   : > { %p3267_p11 = pneg %p3266_p10 }
  0x40   : > { %p3272_p13 = pnand %p3270_p12, %p3267_p11 }
  0x42   : > { %3275 = shalt.err (!%p3272_p13)
}
  0x43   : > { %s3276_s26 = scalar_lea.vmem %s3678_s30, 512  ;;  %p3284_p7 = scmp.lt.s32.totalorder %s3678_s30, %s3678_s30 }
  0x44   : > { %p3277_p0 = scmp.ne.s32.totalorder %s3678_s30, %s3276_s26  ;;  %p3285_p9 = scmp.lt.s32.totalorder %s3276_s26, %s3276_s26 }
  0x46   : > { %p3279_p2 = pnand %p3277_p0, %p3690_p8  ;;  %p3286_p4 = por %p3285_p9, %p3284_p7 }
  0x48   : > { %p3280_p5 = pneg %p3279_p2 }
  0x4a   : > { %p3287_p10 = pnand %p3286_p4, %p3280_p5 }
  0x4c   : > { %3290 = shalt.err (!%p3287_p10)
}
  0x4d   : > { %3099 = dma.hbm_to_vmem [thread:$0]  (!%p3674_p6), %s4260_s3, 512, %s3678_s30, [#allocation10], %s4244_s17, %s4244_s17, %s3555_s18  }
  0x4e   : > { %s3291_s19 = scalar_lea.hbm %s4235_s5, 16 }
  0x4f   : > { %p3292_p11 = scmp.ne.s32.totalorder %s4235_s5, %s3291_s19  ;;  %p3298_p0 = scmp.lt.u32.totalorder %s3291_s19, %s4235_s5 }
  0x51   : > { %p3294_p12 = pnand %p3292_p11, %p3690_p8 }
  0x53   : > { %p3295_p13 = pneg %p3294_p12 }
  0x55   : > { %p3300_p2 = pnand %p3298_p0, %p3295_p13 }
  0x57   : > { %3303 = shalt.err (!%p3300_p2)
}
  0x58   : > { %s3304_s30 = scalar_lea.vmem %s3680_s15, 16  ;;  %s3311_s26 = scalar_lea.vmem %s3680_s15, 32 }
  0x59   : > { %p3305_p5 = scmp.ne.s32.totalorder %s3680_s15, %s3304_s30  ;;  %p3312_p4 = scmp.lt.s32.totalorder %s3680_s15, %s3680_s15 }
  0x5a   : > { %p3313_p10 = scmp.lt.s32.totalorder %s3311_s26, %s3304_s30 }
  0x5b   : > { %p3307_p7 = pnand %p3305_p5, %p3690_p8 }
  0x5c   : > { %p3314_p11 = por %p3313_p10, %p3312_p4 }
  0x5d   : > { %p3308_p9 = pneg %p3307_p7 }
  0x5f   : > { %p3315_p12 = pnand %p3314_p11, %p3308_p9 }
  0x61   : > { %3318 = shalt.err (!%p3315_p12)
}
  0x62   : > { %3105 = dma.hbm_to_vmem [thread:$0]  (!%p3674_p6), %s4235_s5, 16, %s3680_s15, [#allocation13]  }
  0x63   : > { %s3556_s10 = smov [#allocation11]   ;;  %s3557_s19 = smov [#allocation14]  }
  0x64   : > { %s365_s12 = sshll.u32 %s3556_s10, 4  ;;  %s389_s20 = sshll.u32 %s3557_s19, 4  ;;  %s366_s12 = int_to_ptr.vmem [resolvable:$true] %s365_s12  ;;  %s390_s20 = int_to_ptr.vmem [resolvable:$true] %s389_s20 }
  0x65   : > { %s3319_s16 = scalar_lea.hbm %s4234_s4, 512 }
  0x66   : > { %p3320_p13 = scmp.ne.s32.totalorder %s4234_s4, %s3319_s16  ;;  %p3326_p5 = scmp.lt.u32.totalorder %s3319_s16, %s4234_s4 }
  0x68   : > { %p3322_p0 = pnand %p3320_p13, %p3690_p8 }
  0x6a   : > { %p3323_p2 = pneg %p3322_p0 }
  0x6c   : > { %p3328_p7 = pnand %p3326_p5, %p3323_p2 }
  0x6e   : > { %3331 = shalt.err (!%p3328_p7)
}
  0x6f   : > { %s3332_s15 = scalar_lea.vmem %s366_s12, 512  ;;  %p3340_p11 = scmp.lt.s32.totalorder %s366_s12, %s366_s12 }
  0x70   : > { %p3333_p9 = scmp.ne.s32.totalorder %s366_s12, %s3332_s15  ;;  %p3341_p12 = scmp.lt.s32.totalorder %s3332_s15, %s3332_s15 }
  0x72   : > { %p3335_p4 = pnand %p3333_p9, %p3690_p8  ;;  %p3342_p1 = por %p3341_p12, %p3340_p11 }
  0x74   : > { %p3336_p10 = pneg %p3335_p4 }
  0x76   : > { %p3343_p3 = pnand %p3342_p1, %p3336_p10 }
  0x78   : > { %3346 = shalt.err (!%p3343_p3)
}
  0x79   : > { %s4261_s9 = smov 128   ;;  %s3347_s14 = scalar_lea.hbm %s4236_s6, 1536 }
  0x7a   : > { %3102 = dma.hbm_to_vmem [thread:$0]  (!%p3674_p6), %s4234_s4, 512, %s366_s12, [#allocation10], %s4261_s9, %s4261_s9, %s3555_s18  }
  0x7b   : > { %p3348_p1 = scmp.ne.s32.totalorder %s4236_s6, %s3347_s14  ;;  %p3354_p0 = scmp.lt.u32.totalorder %s3347_s14, %s4236_s6 }
  0x7d   : > { %p3350_p3 = pnand %p3348_p1, %p3690_p8 }
  0x7f   : > { %p3351_p13 = pneg %p3350_p3 }
  0x81   : > { %p3356_p2 = pnand %p3354_p0, %p3351_p13 }
  0x83   : > { %3359 = shalt.err (!%p3356_p2)
}
  0x84   : > { %s3360_s15 = scalar_lea.vmem %s390_s20, 1536  ;;  %p3368_p4 = scmp.lt.s32.totalorder %s390_s20, %s390_s20 }
  0x85   : > { %p3361_p5 = scmp.ne.s32.totalorder %s390_s20, %s3360_s15  ;;  %p3369_p10 = scmp.lt.s32.totalorder %s3360_s15, %s3360_s15 }
  0x87   : > { %p3363_p7 = pnand %p3361_p5, %p3690_p8  ;;  %p3370_p11 = por %p3369_p10, %p3368_p4 }
  0x89   : > { %p3364_p9 = pneg %p3363_p7 }
  0x8b   : > { %p3371_p12 = pnand %p3370_p11, %p3364_p9 }
  0x8d   : > { %3374 = shalt.err (!%p3371_p12)
}
  0x8e   : > { %s3558_s18 = smov 768   ;;  %s3559_s12 = smov 48  }
  0x8f   : > { %3108 = dma.hbm_to_vmem [thread:$0]  (!%p3674_p6), %s4236_s6, 1536, %s390_s20, [#allocation13], %s3558_s18, %s3558_s18, %s3559_s12  }
  0x90   : > { %s3560_s10 = smov [#allocation15]   ;;  %s3375_s16 = scalar_lea.hbm %s4237_s7, 1536 }
  0x91   : > { %s402_s19 = sshll.u32 %s3560_s10, 4  ;;  %p3376_p1 = scmp.ne.s32.totalorder %s4237_s7, %s3375_s16  ;;  %s403_s19 = int_to_ptr.vmem [resolvable:$true] %s402_s19 }
  0x92   : > { %p3382_p0 = scmp.lt.u32.totalorder %s3375_s16, %s4237_s7 }
  0x93   : > { %p3378_p3 = pnand %p3376_p1, %p3690_p8 }
  0x95   : > { %p3379_p13 = pneg %p3378_p3 }
  0x97   : > { %p3384_p2 = pnand %p3382_p0, %p3379_p13 }
  0x99   : > { %3387 = shalt.err (!%p3384_p2)
}
  0x9a   : > { %s3388_s20 = scalar_lea.vmem %s403_s19, 1536  ;;  %p3396_p4 = scmp.lt.s32.totalorder %s403_s19, %s403_s19 }
  0x9b   : > { %p3389_p5 = scmp.ne.s32.totalorder %s403_s19, %s3388_s20  ;;  %p3397_p10 = scmp.lt.s32.totalorder %s3388_s20, %s3388_s20 }
  0x9d   : > { %p3391_p7 = pnand %p3389_p5, %p3690_p8  ;;  %p3398_p11 = por %p3397_p10, %p3396_p4 }
  0x9f   : > { %p3392_p9 = pneg %p3391_p7 }
  0xa1   : > { %p3399_p12 = pnand %p3398_p11, %p3392_p9 }
  0xa3   : > { %3402 = shalt.err (!%p3399_p12)
}
  0xa4   : > { %3111 = dma.hbm_to_vmem [thread:$0]  (!%p3674_p6), %s4237_s7, 1536, %s403_s19, [#allocation16], %s3558_s18, %s3558_s18, %s3559_s12  }
  0xa5   : > { %s2709_s25 = sadd.s32 4294967294, %s3549_s24   ;;  %s3823_s13 = sadd.s32 1, %s3549_s24  }
  0xa6   : > { %s38_s10 = ssub.s32 %s3549_s24, %s3823_s13  ;;  %s41_s29 = sadd.s32 1, %s3545_s23 }
  0xa7   : > { %p39_p8 = scmp.eq.s32.totalorder %s38_s10, 0  ;;  %p48_p1 = scmp.ne.s32.totalorder %s3545_s23, %s3541_s22 }
  0xa8   : > { %p49_p3 = scmp.eq.s32.totalorder %s3549_s24, 0  ;;  %p54_p13 = scmp.ne.s32.totalorder %s3541_s22, %s3537_s21 }
  0xa9   : > { %s3834_s14 = scalar_select %p39_p8, %s3545_s23, %s41_s29  }
  0xaa   : > { %p3836_p0 = por %p49_p3, %p48_p1  ;;  %p4263_p2 = scmp.eq.s32.totalorder %s3658_s27, 0 }
  0xab   : > { %p314_p5 = scmp.eq.s32.totalorder %s3658_s27, 1  ;;  %p320_p7 = scmp.eq.s32.totalorder %s2709_s25, 1 }
  0xac   : > { %p3842_p6 = por %p4263_p2, %p54_p13  ;;  %p3129_p9 = scmp.lt.s32.totalorder %s3549_s24, 2 }
  0xad   : > { %s3849_s12 = sand.u32 1, %s3545_s23   ;;  %p3851_p4 = por %p314_p5, %p48_p1 }
  0xae   : > { %s4264_s18 = scalar_select %p3842_p6, 1, 0 }
  0xaf   : > { %s4265_s19 = scalar_select %p3851_p4, 1, 0 }
  0xb0   : > { %p3855_p10 = por %p320_p7, %p54_p13  ;;  %s2718_s26 = sshll.u32 %s3849_s12, 3 }
  0xb1   : > { %s2719_s8 = sshll.u32 %s3549_s24, 7  ;;  %s4267_s0 = sld [smem:[#allocation25_spill]] }
  0xb2   : > { %s4266_s30 = scalar_select %p3855_p10, 1, 0 }
  0xb3   : > { %s432_s17 = scalar_lea.vmem [#allocation3], %s2718_s26  ;;  %p3870_p11 = pnand %p3129_p9, %p3836_p0 }
  0xb4   : > { %s439_s25 = sshll.u32 %s432_s17, 4  ;;  %s429_s2 = scalar_lea.sflag [#allocation4], %s3849_s12  ;;  %s3866_s25 = int_to_ptr.vmem [resolvable:$true] %s439_s25 }
  0xb5   : > { %p3405_p8 = pneg %p3870_p11 }
  0xb7   : > { %s3864_s9 = scalar_lea.hbm %s4267_s0, %s2719_s8  ;;  %s3408_s16 = scalar_lea.hbm %s4267_s0, 256 }
  0xb8   : > { %s3403_s15 = scalar_lea.hbm %s3864_s9, 128  ;;  %p3409_p13 = scmp.lt.u32.totalorder %s3864_s9, %s4267_s0 }
  0xb9   : > { %p3404_p12 = scmp.ne.s32.totalorder %s3864_s9, %s3403_s15  ;;  %p3410_p0 = scmp.lt.u32.totalorder %s3408_s16, %s3403_s15 }
  0xba   : > { %p3412_p5 = scmp.lt.u32.totalorder %s3403_s15, %s3864_s9 }
  0xbb   : > { %p3406_p1 = pnand %p3405_p8, %p3404_p12  ;;  %p3411_p2 = por %p3410_p0, %p3409_p13 }
  0xbd   : > { %p3407_p3 = pneg %p3406_p1  ;;  %p3413_p7 = por %p3412_p5, %p3411_p2 }
  0xbf   : > { %p3414_p9 = pnand %p3413_p7, %p3407_p3 }
  0xc1   : > { %3417 = shalt.err (!%p3414_p9)
}
  0xc2   : > { %s3418_s29 = scalar_lea.vmem %s3866_s25, 128  ;;  %s3561_s26 = smov [#allocation3]  }
  0xc3   : > { %p3419_p12 = scmp.ne.s32.totalorder %s3866_s25, %s3418_s29  ;;  %s3423_s8 = sshll.u32 %s3561_s26, 4  ;;  %s3424_s8 = int_to_ptr.vmem [resolvable:$false] %s3423_s8 }
  0xc4   : > { %s3425_s20 = scalar_lea.vmem %s3424_s8, 256  ;;  %p3426_p4 = scmp.lt.s32.totalorder %s3866_s25, %s3424_s8 }
  0xc5   : > { %p3421_p1 = pnand %p3419_p12, %p3405_p8  ;;  %p3427_p13 = scmp.lt.s32.totalorder %s3425_s20, %s3418_s29 }
  0xc7   : > { %p3422_p10 = pneg %p3421_p1  ;;  %p3428_p0 = por %p3427_p13, %p3426_p4 }
  0xc9   : > { %p3429_p2 = pnand %p3428_p0, %p3422_p10 }
  0xcb   : > { %3432 = shalt.err (!%p3429_p2)
}
  0xcc   : > { %3115 = dma.hbm_to_vmem [thread:$0]  (!%p3870_p11), %s3864_s9, 128, %s3866_s25, %s429_s2  }
  0xcd   : > { %s2720_s15 = sshll.u32 %s3549_s24, 4  ;;  %s449_s16 = scalar_lea.vmem [#allocation6], %s3849_s12 }
  0xce   : > { %s456_s17 = sshll.u32 %s449_s16, 4  ;;  %s3906_s8 = scalar_lea.hbm %s4231_s1, %s2720_s15  ;;  %s457_s17 = int_to_ptr.vmem [resolvable:$true] %s456_s17 }
  0xcf   : > { %s4269_s29 = sand.u32 1, %s3549_s24   ;;  %s3433_s3 = scalar_lea.hbm %s3906_s8, 16 }
  0xd0   : > { %s447_s20 = scalar_lea.sflag [#allocation7], %s4269_s29  ;;  %p3434_p4 = scmp.ne.s32.totalorder %s3906_s8, %s3433_s3 }
  0xd1   : > { %s3438_s9 = scalar_lea.hbm %s4231_s1, 32  ;;  %p3439_p5 = scmp.lt.u32.totalorder %s3906_s8, %s4231_s1 }
  0xd2   : > { %p3436_p10 = pnand %p3434_p4, %p3405_p8  ;;  %p3440_p7 = scmp.lt.u32.totalorder %s3438_s9, %s3433_s3 }
  0xd3   : > { %p3442_p12 = scmp.lt.u32.totalorder %s3433_s3, %s3906_s8 }
  0xd4   : > { %p3437_p3 = pneg %p3436_p10  ;;  %p3441_p9 = por %p3440_p7, %p3439_p5 }
  0xd6   : > { %p3443_p1 = por %p3442_p12, %p3441_p9 }
  0xd8   : > { %p3444_p13 = pnand %p3443_p1, %p3437_p3 }
  0xda   : > { %3447 = shalt.err (!%p3444_p13)
}
  0xdb   : > { %s3448_s15 = scalar_lea.vmem %s457_s17, 16  ;;  %s3562_s16 = smov [#allocation6]  }
  0xdc   : > { %p3449_p0 = scmp.ne.s32.totalorder %s457_s17, %s3448_s15  ;;  %s3453_s26 = sshll.u32 %s3562_s16, 4  ;;  %s3454_s26 = int_to_ptr.vmem [resolvable:$false] %s3453_s26 }
  0xdd   : > { %s3455_s29 = scalar_lea.vmem %s3454_s26, 32  ;;  %p3456_p10 = scmp.lt.s32.totalorder %s457_s17, %s3454_s26 }
  0xde   : > { %p3451_p2 = pnand %p3449_p0, %p3405_p8  ;;  %p3457_p6 = scmp.lt.s32.totalorder %s3455_s29, %s3448_s15 }
  0xe0   : > { %p3452_p4 = pneg %p3451_p2  ;;  %p3458_p5 = por %p3457_p6, %p3456_p10 }
  0xe2   : > { %p3459_p7 = pnand %p3458_p5, %p3452_p4 }
  0xe4   : > { %3462 = shalt.err (!%p3459_p7)
}
  0xe5   : > { %3118 = dma.hbm_to_vmem [thread:$0]  (!%p3870_p11), %s3906_s8, 16, %s457_s17, %s447_s20  }
  0xe6   : > { %p4270_p3 = scmp.ne.s32.totalorder %s4256_s28, 0 }
  0xe7   : > { %s3932_s3 = sand.u32 (!%p4270_p3), 1, %s3541_s22   ;;  %p4271_p8 = scmp.ne.s32.totalorder (!%p4270_p3), %s4264_s18, 0 }
  0xe8   : > { %465 = sbr.rel (%p4270_p3) target bundleno = 7189 (0x1c15), region = 68  ;;  %s2722_s2 = sshll.u32 (!%p4270_p3), %s3932_s3, 3 }
  0xe9   : > { %s468_s12 = scalar_lea.sflag (!%p4270_p3), [#allocation4], %s3932_s3  ;;  %s471_s9 = scalar_lea.vmem (!%p4270_p3), [#allocation3], %s2722_s2 }
  0xef   : > { %3508 = dma.done.wait (%p4271_p8), %s468_s12, 128  }
  0xf0   : > { %3510 = vsyncadd (%p4271_p8), %s468_s12, 4294967168  ;;  %s476_s10 = sand.u32 1, %s3658_s27   ;;  %s479_s17 = scalar_lea.vmem [#allocation6], %s3932_s3 }
  0xf1   : > { %s477_s28 = scalar_lea.sflag [#allocation7], %s476_s10 }
  0xf2   : > { %3512 = dma.done.wait (%p4271_p8), %s477_s28, 16  }
  0xf3   : > { %3514 = vsyncadd (%p4271_p8), %s477_s28, 4294967280  ;;  %p4272_p6 = scmp.eq.s32.totalorder %s3658_s27, 0 }
  0xf5   : > { %3516 = dma.done.wait (%p4272_p6), [#allocation7], 512   ;;  %p4273_p11 = pmov %p4272_p6 }
  0xf6   : > { %p4274_p9 = pmov %p4272_p6 }
  0xf7   : > { %3518 = vsyncadd (%p4273_p11), [#allocation7], 4294966784 }
  0xf8   : > { %3520 = dma.done.wait (%p4274_p9), [#allocation10], 1024   ;;  %p4275_p12 = pmov %p4272_p6 }
  0xf9   : > { %p4276_p1 = pmov %p4272_p6 }
  0xfa   : > { %3522 = vsyncadd (%p4275_p12), [#allocation10], 4294966272 }
  0xfb   : > { %3524 = dma.done.wait (%p4276_p1), [#allocation13], 1552   ;;  %p4277_p13 = pmov %p4276_p1 }
  0xfc   : > { %p4278_p0 = pmov %p4276_p1 }
  0xfd   : > { %3526 = vsyncadd (%p4277_p13), [#allocation13], 4294965744 }
  0xfe   : > { %3528 = dma.done.wait (%p4278_p0), [#allocation16], 1536   ;;  %p4279_p2 = pmov %p4278_p0 }
  0xff   : > { %v3563_v0 = vmov 0.0   ;;  %vm3564_vm0 = vmmov 0   ;;  %v3565_v1 = vmov 0.0|0.0   ;;  %vm550_vm1 = vcmask 64512   ;;  %v548_v2 = vld [vmem:[%s471_s9] sm:$0xff]  ;;  %v3971_v3 = vld [vmem:[%s4241_s11] sm:$0xff] }
 0x100   : > { %3530 = vsyncadd (%p4279_p2), [#allocation16], 4294965760  ;;  %2836 = vmatprep.subr.mxu0 %v3563_v0  ;;  %2838 = vmatprep.mubr.msk.f32.mxu0 %vm3564_vm0, %v3563_v0  ;;  %v628_v4 = vld [vmem:[#allocation9] sm:$0xff]  ;;  %v629_v5 = vld [vmem:[#allocation9 + $0x8] sm:$0xff]  ;;  %vm632_vm2 = vcmask 261120   ;;  %s3566_s20 = smov 64  }
 0x101   : > { %2971 = vmatprep.subr.bf16.mxu1 %v3565_v1  ;;  %2849 = vmatprep.mubr.msk.f32.mxu1 %vm3564_vm0, %v3563_v0  ;;  %v624_v6 = vld [vmem:[#allocation8] sm:$0xff]  ;;  %v625_v7 = vld [vmem:[#allocation8 + $0x8] sm:$0xff]  ;;  %v2972_v8 = vpack.c.bf16 %v629_v5, %v628_v4  ;;  %v630_v10 = vld [vmem:[#allocation9 + $0x10] sm:$0xff]  ;;  %s3567_s0 = smov 32   ;;  %vm894_vm3 = vcmask 253952   ;;  %vm1004_vm4 = vcmask 254977  }
 0x102   : > { %2837 = vmatpush3.msra.mxu0 %v548_v2  ;;  %v2978_v9 = vpack.c.bf16 %v625_v7, %v624_v6  ;;  %v631_v11 = vld [vmem:[#allocation9 + $0x18] sm:$0xff]  ;;  %v626_v12 = vld [vmem:[#allocation8 + $0x10] sm:$0xff]  ;;  %v787_v16 = vld [vmem:[#allocation11] sm:$0xff]  ;;  %vm1230_vm5 = vcmask 257027   ;;  %vm1456_vm6 = vcmask 259077   ;;  %vm1117_vm7 = vcmask 256002  }
 0x103   : > { %2839 = vmatmul.mubr.msk.f32.vlgmr.msra.gmra.mrb[0].mxu0 %vm550_vm1, %v3971_v3  ;;  %2977 = vmatprep.subr.bf16.mxu0 %v3565_v1  ;;  %v627_v13 = vld [vmem:[#allocation8 + $0x18] sm:$0xff]  ;;  %v2975_v14 = vpack.c.bf16 %v631_v11, %v630_v10  ;;  %v788_v17 = vld [vmem:[#allocation11 + $0x8] sm:$0xff]  ;;  %v789_v19 = vld [vmem:[#allocation11 + $0x10] sm:$0xff]  ;;  %vm1343_vm8 = vcmask 258052   ;;  %vm1569_vm9 = vcmask 260102   ;;  %vm1682_vm10 = vcmask 261127  }
 0x104   : > { %2860 = vmatprep.mubr.msk.f32.mxu0 %vm3564_vm0, %v3563_v0  ;;  %2973 = vmatpush3.bf16.msra.mxu1 %v2972_v8  ;;  %v2981_v15 = vpack.c.bf16 %v627_v13, %v626_v12  ;;  %v3982_v18 = vpack.c.bf16 %v788_v17, %v787_v16  ;;  %v790_v20 = vld [vmem:[#allocation11 + $0x18] sm:$0xff]  ;;  %v2732_v29 = vld [vmem:[#allocation12] ss:$0 sm:$0xff]  ;;  %s3568_s25 = smov 112   ;;  %s4280_s26 = sld [smem:[#allocation29_spill]]  ;;  %vm1783_vm11 = vcmask 130048  }
 0x105   : > { %2979 = vmatpush3.bf16.msra.mxu0 %v2978_v9  ;;  %2974 = vmatprep.subr.bf16.mxu1 %v3565_v1  ;;  %v3989_v21 = vpack.c.bf16 %v790_v20, %v789_v19  ;;  %s4281_s12 = sld [smem:[#allocation30_spill]]  ;;  %s4282_s28 = sld [smem:[#allocation28_spill]]  ;;  %vm2290_vm12 = vcmask 523264  }
 0x106   : > { %2980 = vmatprep.subr.bf16.mxu0 %v3565_v1  ;;  %s3061_s18 = smul.u32 24, %s3932_s3  ;;  %s4283_s15 = sld [smem:[#allocation31_spill]] }
 0x107   : > { %p4284_p10 = scmp.ne.s32.totalorder %s4265_s19, 0  ;;  %s3569_s29 = smov [#allocation17]  }
 0x108   : > { %2976 = vmatpush3.bf16.msra.mxu1 %v2975_v14  ;;  %s547_s8 = scalar_lea.vmem [#allocation17], %s3061_s18  ;;  %s3467_s2 = sshll.u32 %s3569_s29, 4  ;;  %s3468_s2 = int_to_ptr.vmem [resolvable:$false] %s3467_s2 }
 0x109   : > { %2982 = vmatpush3.bf16.msra.mxu0 %v2981_v15  ;;  %2983 = vmatprep.subr.bf16.mxu1 %v3565_v1 }
 0x10a   : > { %2989 = vmatprep.subr.bf16.mxu0 %v3565_v1 }
 0x10c   : > { %2861 = vmatmul.mubr.msk.f32.vlgmr.msra.gmra.mrb[2].mxu0 %vm632_vm2, %v548_v2 }
 0x10d   : > { %2991 = vmatpush3.bf16.msra.mxu0 %v3982_v18  ;;  %2882 = vmatprep.mubr.msk.f32.mxu0 %vm3564_vm0, %v3563_v0 }
 0x10e   : > { %2992 = vmatprep.subr.bf16.mxu0 %v3565_v1 }
 0x111   : > { %2994 = vmatpush3.bf16.msra.mxu0 %v3989_v21 }
 0x112   : > { %3001 = vmatprep.subr.bf16.mxu0 %v3565_v1 }
 0x1d6   : > { %v620_v22 = vpop.f32.mrb[0].mxu0 }
 0x1d7   : > { %v2840_v23 = vpop.f32.mrb[1].mxu0  ;;  %2850 = vmatmul.mubr.msk.f32.vlgmr.msra.gmra.mrb[0].mxu1 %vm632_vm2, %v620_v22 }
 0x1d8   : > { %2985 = vmatpush3.bf16.msra.mxu1 %v3982_v18  ;;  %2871 = vmatprep.mubr.msk.f32.mxu1 %vm3564_vm0, %v3563_v0 }
 0x1d9   : > { %2986 = vmatprep.subr.bf16.mxu1 %v3565_v1 }
 0x1dc   : > { %2988 = vmatpush3.bf16.msra.mxu1 %v3989_v21 }
 0x1dd   : > { %2995 = vmatprep.subr.bf16.mxu1 %v3565_v1 }
 0x1df   : > { %2872 = vmatmul.mubr.f32.vlgmr.msra.gmra.mrb[2].mxu1 %v3563_v0  ;;  %v775_v24 = vpop.f32.mrb[2].mxu0 }
 0x1e0   : > { %2997 = vmatpush3.bf16.msra.mxu1 %v3982_v18  ;;  %2893 = vmatprep.mubr.msk.f32.mxu1 %vm3564_vm0, %v3563_v0  ;;  %v2862_v25 = vpop.f32.mrb[3].mxu0 }
 0x1e1   : > { %2998 = vmatprep.subr.bf16.mxu1 %v3565_v1 }
 0x1e4   : > { %3000 = vmatpush3.bf16.msra.mxu1 %v3989_v21 }
 0x1e5   : > { %3007 = vmatprep.subr.bf16.mxu1 %v3565_v1 }
 0x2aa   : > { %v702_v26 = vpop.f32.mrb[0].mxu1 }
 0x2ab   : > { %v776_v27 = vadd.f32 %v775_v24, %v702_v26  ;;  %v2851_v28 = vpop.f32.mrb[1].mxu1 }
 0x2ad   : > { %v4007_v30 = vadd.f32 %v2732_v29, %v776_v27 }
 0x2b2   : > { %v860_v31 = vpop.f32.mrb[2].mxu1 }
 0x2b3   : > { %v864_v32 = vadd.f32 %v860_v31, %v4007_v30  ;;  %v2873_v33 = vpop.f32.mrb[3].mxu1 }
 0x2b5   : > { %v2733_v34 = vmul.f32 -1.442695, %v864_v32 }
 0x2b7   : > { %3187 = vpow2.f32 %v2733_v34 }
 0x2c1   : > { %v3188_v35 = vpop.eup %3187 }
 0x2c2   : > { %v868_v36 = vadd.f32 1.0, %v3188_v35 }
 0x2c4   : > { %3189 = vrcp.f32 %v868_v36 }
 0x2ce   : > { %v3190_v37 = vpop.eup %3189 }
 0x2cf   : > { %v871_v38 = vmul.f32 2.0, %v3190_v37  ;;  %v873_v42 = vmul.f32 0.0, %v3190_v37 }
 0x2d1   : > { %v2734_v39 = vadd.f32 -1.0, %v871_v38 }
 0x2d3   : > { %875 = vrot.lane.b32.xlu0 %v2734_v39, %s3566_s20 }
 0x345   : > { %v876_v40 = vpop.permute.xlu0 %875 }
 0x346   : > { %v878_v41 = vmul.f32 %v3190_v37, %v876_v40 }
 0x348   : > { %880 = vrot.lane.b32.xlu0 %v878_v41, %s3567_s0 }
 0x3ba   : > { %v881_v43 = vpop.permute.xlu0 %880 }
 0x3bb   : > { %v883_v44 = vadd.f32 %v881_v43, %v873_v42 }
 0x3bd   : > { %3191 = vtanh.f32 %v883_v44  ;;  %v981_v61 = vrot.slane %v883_v44, 7 }
 0x3c7   : > { %v3192_v45 = vpop.eup %3191 }
 0x3c8   : > { %886 = vrot.lane.b32.xlu1 %v3192_v45, %s3566_s20 }
 0x43a   : > { %v887_v46 = vpop.permute.xlu1 %886 }
 0x43b   : > { %v889_v47 = vmul.f32 %v3190_v37, %v887_v46 }
 0x43d   : > { %891 = vrot.lane.b32.xlu1 %v889_v47, %s3567_s0 }
 0x4af   : > { %v892_v48 = vpop.permute.xlu1 %891 }
 0x4b0   : > { %895 = vst.msk [vmem:[#allocation2] sm:$0x1] %vm894_vm3, %v892_v48  ;;  %2883 = vmatmul.mubr.msk.f32.vlgmr.msra.gmra.mrb[4].mxu0 %vm632_vm2, %v892_v48 }
 0x4b1   : > { %3003 = vmatpush3.bf16.msra.mxu0 %v3982_v18  ;;  %2904 = vmatprep.mubr.msk.f32.mxu0 %vm3564_vm0, %v3563_v0 }
 0x4b2   : > { %3004 = vmatprep.subr.bf16.mxu0 %v3565_v1 }
 0x4b5   : > { %3006 = vmatpush3.bf16.msra.mxu0 %v3989_v21 }
 0x4b6   : > { %3013 = vmatprep.subr.bf16.mxu0 %v3565_v1 }
 0x583   : > { %v964_v49 = vpop.f32.mrb[4].mxu0 }
 0x584   : > { %v969_v50 = vrot.slane %v964_v49, 7  ;;  %v2884_v51 = vpop.f32.mrb[5].mxu0 }
 0x586   : > { %v971_v52 = vadd.f32 %v969_v50, %v4007_v30 }
 0x588   : > { %v2736_v53 = vmul.f32 -1.442695, %v971_v52 }
 0x58a   : > { %3193 = vpow2.f32 %v2736_v53 }
 0x594   : > { %v3194_v54 = vpop.eup %3193 }
 0x595   : > { %v975_v55 = vadd.f32 1.0, %v3194_v54 }
 0x597   : > { %3195 = vrcp.f32 %v975_v55 }
 0x5a1   : > { %v3196_v56 = vpop.eup %3195 }
 0x5a2   : > { %v978_v57 = vmul.f32 2.0, %v3196_v56  ;;  %v983_v62 = vmul.f32 %v3196_v56, %v981_v61 }
 0x5a4   : > { %v2737_v58 = vadd.f32 -1.0, %v978_v57 }
 0x5a6   : > { %985 = vrot.lane.b32.xlu0 %v2737_v58, %s3566_s20 }
 0x618   : > { %v986_v59 = vpop.permute.xlu0 %985 }
 0x619   : > { %v988_v60 = vmul.f32 %v3196_v56, %v986_v59 }
 0x61b   : > { %990 = vrot.lane.b32.xlu1 %v988_v60, %s3567_s0 }
 0x68d   : > { %v991_v63 = vpop.permute.xlu1 %990 }
 0x68e   : > { %v993_v2 = vadd.f32 %v991_v63, %v983_v62 }
 0x690   : > { %3197 = vtanh.f32 %v993_v2  ;;  %v1094_v23 = vrot.slane %v993_v2, 7 }
 0x69a   : > { %v3198_v4 = vpop.eup %3197 }
 0x69b   : > { %996 = vrot.lane.b32.xlu0 %v3198_v4, %s3566_s20 }
 0x70d   : > { %v997_v5 = vpop.permute.xlu0 %996 }
 0x70e   : > { %v4025_v6 = vmul.f32 %v3196_v56, %v997_v5 }
 0x710   : > { %v1006_v7 = vrot.slane %v4025_v6, 1 }
 0x712   : > { %1007 = vrot.lane.b32.xlu1 %v1006_v7, %s3567_s0 }
 0x784   : > { %v1008_v8 = vpop.permute.xlu1 %1007 }
 0x785   : > { %2894 = vmatmul.mubr.msk.f32.vlgmr.msra.gmra.mrb[4].mxu1 %vm632_vm2, %v1008_v8 }
 0x786   : > { %3009 = vmatpush3.bf16.msra.mxu1 %v3982_v18  ;;  %2915 = vmatprep.mubr.msk.f32.mxu1 %vm3564_vm0, %v3563_v0 }
 0x787   : > { %3010 = vmatprep.subr.bf16.mxu1 %v3565_v1 }
 0x78a   : > { %3012 = vmatpush3.bf16.msra.mxu1 %v3989_v21 }
 0x78b   : > { %3019 = vmatprep.subr.bf16.mxu1 %v3565_v1 }
 0x858   : > { %v1077_v9 = vpop.f32.mrb[4].mxu1 }
 0x859   : > { %v1082_v10 = vrot.slane %v1077_v9, 6  ;;  %v2895_v11 = vpop.f32.mrb[5].mxu1 }
 0x85b   : > { %v1084_v12 = vadd.f32 %v1082_v10, %v4007_v30 }
 0x85d   : > { %v2739_v13 = vmul.f32 -1.442695, %v1084_v12 }
 0x85f   : > { %3199 = vpow2.f32 %v2739_v13 }
 0x869   : > { %v3200_v14 = vpop.eup %3199 }
 0x86a   : > { %v1088_v15 = vadd.f32 1.0, %v3200_v14 }
 0x86c   : > { %3201 = vrcp.f32 %v1088_v15 }
 0x876   : > { %v3202_v16 = vpop.eup %3201 }
 0x877   : > { %v1091_v17 = vmul.f32 2.0, %v3202_v16  ;;  %v1096_v24 = vmul.f32 %v3202_v16, %v1094_v23 }
 0x879   : > { %v2740_v19 = vadd.f32 -1.0, %v1091_v17 }
 0x87b   : > { %1098 = vrot.lane.b32.xlu0 %v2740_v19, %s3566_s20 }
 0x8ed   : > { %v1099_v20 = vpop.permute.xlu0 %1098 }
 0x8ee   : > { %v1101_v22 = vmul.f32 %v3202_v16, %v1099_v20 }
 0x8f0   : > { %1103 = vrot.lane.b32.xlu1 %v1101_v22, %s3567_s0 }
 0x962   : > { %v1104_v25 = vpop.permute.xlu1 %1103 }
 0x963   : > { %v1106_v26 = vadd.f32 %v1104_v25, %v1096_v24 }
 0x965   : > { %3203 = vtanh.f32 %v1106_v26  ;;  %v1207_v45 = vrot.slane %v1106_v26, 7 }
 0x96f   : > { %v3204_v27 = vpop.eup %3203 }
 0x970   : > { %1109 = vrot.lane.b32.xlu0 %v3204_v27, %s3566_s20 }
 0x9e2   : > { %v1110_v28 = vpop.permute.xlu0 %1109 }
 0x9e3   : > { %v4040_v29 = vmul.f32 %v3202_v16, %v1110_v28 }
 0x9e5   : > { %v1119_v31 = vrot.slane %v4040_v29, 2 }
 0x9e7   : > { %1120 = vrot.lane.b32.xlu1 %v1119_v31, %s3567_s0 }
 0xa59   : > { %v1121_v32 = vpop.permute.xlu1 %1120 }
 0xa5a   : > { %2905 = vmatmul.mubr.msk.f32.vlgmr.msra.gmra.mrb[6].mxu0 %vm632_vm2, %v1121_v32 }
 0xa5b   : > { %3015 = vmatpush3.bf16.msra.mxu0 %v3982_v18  ;;  %2926 = vmatprep.mubr.msk.f32.mxu0 %vm3564_vm0, %v3563_v0 }
 0xa5c   : > { %3016 = vmatprep.subr.bf16.mxu0 %v3565_v1 }
 0xa5f   : > { %3018 = vmatpush3.bf16.msra.mxu0 %v3989_v21 }
 0xa60   : > { %3025 = vmatprep.subr.bf16.mxu0 %v3565_v1 }
 0xb2d   : > { %v1190_v33 = vpop.f32.mrb[6].mxu0 }
 0xb2e   : > { %v1195_v34 = vrot.slane %v1190_v33, 5  ;;  %v2906_v35 = vpop.f32.mrb[7].mxu0 }
 0xb30   : > { %v1197_v36 = vadd.f32 %v1195_v34, %v4007_v30 }
 0xb32   : > { %v2742_v37 = vmul.f32 -1.442695, %v1197_v36 }
 0xb34   : > { %3205 = vpow2.f32 %v2742_v37 }
 0xb3e   : > { %v3206_v38 = vpop.eup %3205 }
 0xb3f   : > { %v1201_v39 = vadd.f32 1.0, %v3206_v38 }
 0xb41   : > { %3207 = vrcp.f32 %v1201_v39 }
 0xb4b   : > { %v3208_v40 = vpop.eup %3207 }
 0xb4c   : > { %v1204_v41 = vmul.f32 2.0, %v3208_v40  ;;  %v1209_v46 = vmul.f32 %v3208_v40, %v1207_v45 }
 0xb4e   : > { %v2743_v42 = vadd.f32 -1.0, %v1204_v41 }
 0xb50   : > { %1211 = vrot.lane.b32.xlu0 %v2743_v42, %s3566_s20 }
 0xbc2   : > { %v1212_v43 = vpop.permute.xlu0 %1211 }
 0xbc3   : > { %v1214_v44 = vmul.f32 %v3208_v40, %v1212_v43 }
 0xbc5   : > { %1216 = vrot.lane.b32.xlu1 %v1214_v44, %s3567_s0 }
 0xc37   : > { %v1217_v47 = vpop.permute.xlu1 %1216 }
 0xc38   : > { %v1219_v48 = vadd.f32 %v1217_v47, %v1209_v46 }
 0xc3a   : > { %3209 = vtanh.f32 %v1219_v48  ;;  %v1320_v5 = vrot.slane %v1219_v48, 7 }
 0xc44   : > { %v3210_v49 = vpop.eup %3209 }
 0xc45   : > { %1222 = vrot.lane.b32.xlu0 %v3210_v49, %s3566_s20 }
 0xcb7   : > { %v1223_v50 = vpop.permute.xlu0 %1222 }
 0xcb8   : > { %v4055_v51 = vmul.f32 %v3208_v40, %v1223_v50 }
 0xcba   : > { %v1232_v52 = vrot.slane %v4055_v51, 3 }
 0xcbc   : > { %1233 = vrot.lane.b32.xlu1 %v1232_v52, %s3567_s0 }
 0xd2e   : > { %v1234_v53 = vpop.permute.xlu1 %1233 }
 0xd2f   : > { %2916 = vmatmul.mubr.msk.f32.vlgmr.msra.gmra.mrb[6].mxu1 %vm632_vm2, %v1234_v53 }
 0xd30   : > { %3021 = vmatpush3.bf16.msra.mxu1 %v3982_v18  ;;  %2937 = vmatprep.mubr.msk.f32.mxu1 %vm3564_vm0, %v3563_v0 }
 0xd31   : > { %3022 = vmatprep.subr.bf16.mxu1 %v3565_v1 }
 0xd34   : > { %3024 = vmatpush3.bf16.msra.mxu1 %v3989_v21 }
 0xd35   : > { %2951 = vmatprep.subr.mxu1 %v3563_v0 }
 0xe02   : > { %v1303_v54 = vpop.f32.mrb[6].mxu1 }
 0xe03   : > { %v1308_v55 = vrot.slane %v1303_v54, 4  ;;  %v2917_v56 = vpop.f32.mrb[7].mxu1 }
 0xe05   : > { %v1310_v57 = vadd.f32 %v1308_v55, %v4007_v30 }
 0xe07   : > { %v2745_v58 = vmul.f32 -1.442695, %v1310_v57 }
 0xe09   : > { %3211 = vpow2.f32 %v2745_v58 }
 0xe13   : > { %v3212_v59 = vpop.eup %3211 }
 0xe14   : > { %v1314_v60 = vadd.f32 1.0, %v3212_v59 }
 0xe16   : > { %3213 = vrcp.f32 %v1314_v60 }
 0xe20   : > { %v3214_v61 = vpop.eup %3213 }
 0xe21   : > { %v1317_v62 = vmul.f32 2.0, %v3214_v61  ;;  %v1322_v7 = vmul.f32 %v3214_v61, %v1320_v5 }
 0xe23   : > { %v2746_v63 = vadd.f32 -1.0, %v1317_v62 }
 0xe25   : > { %1324 = vrot.lane.b32.xlu0 %v2746_v63, %s3566_s20 }
 0xe97   : > { %v1325_v2 = vpop.permute.xlu0 %1324 }
 0xe98   : > { %v1327_v4 = vmul.f32 %v3214_v61, %v1325_v2 }
 0xe9a   : > { %1329 = vrot.lane.b32.xlu1 %v1327_v4, %s3567_s0 }
 0xf0c   : > { %v1330_v8 = vpop.permute.xlu1 %1329 }
 0xf0d   : > { %v1332_v9 = vadd.f32 %v1330_v8, %v1322_v7 }
 0xf0f   : > { %3215 = vtanh.f32 %v1332_v9 }
 0xf19   : > { %v3216_v10 = vpop.eup %3215 }
 0xf1a   : > { %1335 = vrot.lane.b32.xlu0 %v3216_v10, %s3566_s20 }
 0xf8c   : > { %v1336_v11 = vpop.permute.xlu0 %1335 }
 0xf8d   : > { %v4070_v12 = vmul.f32 %v3214_v61, %v1336_v11 }
 0xf8f   : > { %v1345_v13 = vrot.slane %v4070_v12, 4 }
 0xf91   : > { %1346 = vrot.lane.b32.xlu1 %v1345_v13, %s3567_s0 }
0x1003   : > { %v1347_v14 = vpop.permute.xlu1 %1346 }
0x1004   : > { %2927 = vmatmul.mubr.msk.f32.vlgmr.msra.gmra.mrb[8].mxu0 %vm632_vm2, %v1347_v14 }
0x1005   : > { %3027 = vmatpush3.bf16.msra.mxu0 %v3982_v18  ;;  %2948 = vmatprep.mubr.msk.f32.mxu0 %vm3564_vm0, %v3563_v0 }
0x1006   : > { %3028 = vmatprep.subr.bf16.mxu0 %v3565_v1  ;;  %v1433_v1 = vrot.slane %v1332_v9, 7 }
0x1009   : > { %3030 = vmatpush3.bf16.msra.mxu0 %v3989_v21 }
0x10d7   : > { %v1416_v15 = vpop.f32.mrb[8].mxu0 }
0x10d8   : > { %v1421_v16 = vrot.slane %v1416_v15, 3  ;;  %v2928_v17 = vpop.f32.mrb[9].mxu0 }
0x10da   : > { %v1423_v19 = vadd.f32 %v1421_v16, %v4007_v30 }
0x10dc   : > { %v2748_v20 = vmul.f32 -1.442695, %v1423_v19 }
0x10de   : > { %3217 = vpow2.f32 %v2748_v20 }
0x10e8   : > { %v3218_v22 = vpop.eup %3217 }
0x10e9   : > { %v1427_v23 = vadd.f32 1.0, %v3218_v22 }
0x10eb   : > { %3219 = vrcp.f32 %v1427_v23 }
0x10f5   : > { %v3220_v24 = vpop.eup %3219 }
0x10f6   : > { %v1430_v25 = vmul.f32 2.0, %v3220_v24  ;;  %v1435_v21 = vmul.f32 %v3220_v24, %v1433_v1 }
0x10f8   : > { %v2749_v18 = vadd.f32 -1.0, %v1430_v25 }
0x10fa   : > { %1437 = vrot.lane.b32.xlu0 %v2749_v18, %s3566_s20  ;;  %v1777_v18 = vld [vmem:[#allocation15 + $0x30] sm:$0xff] }
0x116c   : > { %v1438_v26 = vpop.permute.xlu0 %1437 }
0x116d   : > { %v1440_v27 = vmul.f32 %v3220_v24, %v1438_v26 }
0x116f   : > { %1442 = vrot.lane.b32.xlu1 %v1440_v27, %s3567_s0 }
0x11e1   : > { %v1443_v28 = vpop.permute.xlu1 %1442 }
0x11e2   : > { %v1445_v31 = vadd.f32 %v1443_v28, %v1435_v21  ;;  %v1774_v21 = vld [vmem:[#allocation15 + $0x18] sm:$0xff]  ;;  %v1780_v28 = vld [vmem:[#allocation15 + $0x48] sm:$0xff] }
0x11e4   : > { %3221 = vtanh.f32 %v1445_v31  ;;  %v1546_v49 = vrot.slane %v1445_v31, 7  ;;  %v1773_v31 = vld [vmem:[#allocation15 + $0x10] sm:$0xff] }
0x11ee   : > { %v3222_v32 = vpop.eup %3221 }
0x11ef   : > { %1448 = vrot.lane.b32.xlu0 %v3222_v32, %s3566_s20  ;;  %v1779_v32 = vld [vmem:[#allocation15 + $0x40] sm:$0xff] }
0x1261   : > { %v1449_v33 = vpop.permute.xlu0 %1448 }
0x1262   : > { %v1451_v34 = vmul.f32 %v3220_v24, %v1449_v33  ;;  %v1772_v24 = vld [vmem:[#allocation15 + $0x8] sm:$0xff]  ;;  %v3035_v33 = vpack.c.bf16 %v1780_v28, %v1774_v21 }
0x1264   : > { %v1458_v35 = vrot.slane %v1451_v34, 5 }
0x1266   : > { %1459 = vrot.lane.b32.xlu1 %v1458_v35, %s3567_s0 }
0x12d8   : > { %v1460_v36 = vpop.permute.xlu1 %1459 }
0x12d9   : > { %2938 = vmatmul.mubr.msk.f32.vlgmr.msra.gmra.mrb[8].mxu1 %vm632_vm2, %v1460_v36  ;;  %v1776_v36 = vld [vmem:[#allocation15 + $0x28] sm:$0xff] }
0x12da   : > { %2953 = vmatprep.mubr.msk.f32.mxu1 %vm3564_vm0, %v3563_v0 }
0x13ac   : > { %v1529_v37 = vpop.f32.mrb[8].mxu1 }
0x13ad   : > { %v1534_v38 = vrot.slane %v1529_v37, 2  ;;  %v2939_v39 = vpop.f32.mrb[9].mxu1  ;;  %v1782_v37 = vld [vmem:[#allocation15 + $0x58] sm:$0xff] }
0x13ae   : > { %v1762_v39 = vld [vmem:[#allocation14 + $0x18] sm:$0xff] }
0x13af   : > { %v1536_v40 = vadd.f32 %v1534_v38, %v4007_v30  ;;  %v3039_v38 = vpack.c.bf16 %v1782_v37, %v1776_v36 }
0x13b1   : > { %v2751_v41 = vmul.f32 -1.442695, %v1536_v40  ;;  %v1768_v40 = vld [vmem:[#allocation14 + $0x48] sm:$0xff] }
0x13b3   : > { %3223 = vpow2.f32 %v2751_v41  ;;  %v3047_v41 = vpack.c.bf16 %v1768_v40, %v1762_v39 }
0x13bd   : > { %v3224_v42 = vpop.eup %3223 }
0x13be   : > { %v1540_v43 = vadd.f32 1.0, %v3224_v42  ;;  %v4119_v42 = vld [vmem:[%s4280_s26] sm:$0xff] }
0x13c0   : > { %3225 = vrcp.f32 %v1540_v43  ;;  %v1775_v43 = vld [vmem:[#allocation15 + $0x20] sm:$0xff] }
0x13ca   : > { %v3226_v44 = vpop.eup %3225 }
0x13cb   : > { %v1543_v45 = vmul.f32 2.0, %v3226_v44  ;;  %v1548_v50 = vmul.f32 %v3226_v44, %v1546_v49 }
0x13cd   : > { %v2752_v46 = vadd.f32 -1.0, %v1543_v45  ;;  %v1761_v45 = vld [vmem:[#allocation14 + $0x10] sm:$0xff] }
0x13cf   : > { %1550 = vrot.lane.b32.xlu0 %v2752_v46, %s3566_s20  ;;  %v1767_v46 = vld [vmem:[#allocation14 + $0x40] sm:$0xff] }
0x1441   : > { %v1551_v47 = vpop.permute.xlu0 %1550 }
0x1442   : > { %v1553_v48 = vmul.f32 %v3226_v44, %v1551_v47  ;;  %v1760_v47 = vld [vmem:[#allocation14 + $0x8] sm:$0xff] }
0x1444   : > { %1555 = vrot.lane.b32.xlu1 %v1553_v48, %s3567_s0  ;;  %v1766_v48 = vld [vmem:[#allocation14 + $0x38] sm:$0xff] }
0x14b6   : > { %v1556_v52 = vpop.permute.xlu1 %1555 }
0x14b7   : > { %v1558_v53 = vadd.f32 %v1556_v52, %v1548_v50  ;;  %v3049_v50 = vpack.c.bf16 %v1767_v46, %v1761_v45  ;;  %v3043_v52 = vpack.c.bf16 %v1766_v48, %v1760_v47 }
0x14b9   : > { %3227 = vtanh.f32 %v1558_v53 }
0x14c3   : > { %v3228_v54 = vpop.eup %3227 }
0x14c4   : > { %1561 = vrot.lane.b32.xlu0 %v3228_v54, %s3566_s20  ;;  %v1765_v54 = vld [vmem:[#allocation14 + $0x30] sm:$0xff] }
0x1536   : > { %v1562_v55 = vpop.permute.xlu0 %1561 }
0x1537   : > { %v1564_v56 = vmul.f32 %v3226_v44, %v1562_v55  ;;  %v1781_v44 = vld [vmem:[#allocation15 + $0x50] sm:$0xff] }
0x1538   : > { %v3041_v49 = vpack.c.bf16 %v1781_v44, %v1775_v43 }
0x1539   : > { %v1571_v57 = vrot.slane %v1564_v56, 6 }
0x153b   : > { %1572 = vrot.lane.b32.xlu1 %v1571_v57, %s3567_s0  ;;  %v1770_v57 = vld [vmem:[#allocation14 + $0x58] sm:$0xff] }
0x15ad   : > { %v1573_v58 = vpop.permute.xlu1 %1572 }
0x15ae   : > { %2949 = vmatmul.mubr.msk.f32.vlgmr.msra.gmra.mrb[10].mxu0 %vm632_vm2, %v1573_v58 }
0x15af   : > { %1851 = vmatprep.mubr.f32.mxu0 %v3563_v0 }
0x1681   : > { %v1642_v59 = vpop.f32.mrb[10].mxu0 }
0x1682   : > { %v1647_v60 = vrot.slane %v1642_v59, 1  ;;  %v2950_v61 = vpop.f32.mrb[11].mxu0 }
0x1683   : > { %v1763_v61 = vld [vmem:[#allocation14 + $0x20] sm:$0xff] }
0x1684   : > { %v1649_v62 = vadd.f32 %v1647_v60, %v4007_v30  ;;  %v1659_v30 = vrot.slane %v1558_v53, 7  ;;  %v1759_v53 = vld [vmem:[#allocation14] sm:$0xff] }
0x1685   : > { %v3045_v59 = vpack.c.bf16 %v1765_v54, %v1759_v53 }
0x1686   : > { %v2754_v63 = vmul.f32 -1.442695, %v1649_v62  ;;  %v1769_v62 = vld [vmem:[#allocation14 + $0x50] sm:$0xff] }
0x1688   : > { %3229 = vpow2.f32 %v2754_v63  ;;  %v3053_v63 = vpack.c.bf16 %v1769_v62, %v1763_v61 }
0x1692   : > { %v3230_v2 = vpop.eup %3229 }
0x1693   : > { %v1653_v4 = vadd.f32 1.0, %v3230_v2  ;;  %v2217_v2 = vlaneseq }
0x1695   : > { %3231 = vrcp.f32 %v1653_v4  ;;  %v4149_v4 = vshrl.u32 %v2217_v2, 7 }
0x169f   : > { %v3232_v5 = vpop.eup %3231 }
0x16a0   : > { %v1656_v7 = vmul.f32 2.0, %v3232_v5  ;;  %v1661_v11 = vmul.f32 %v3232_v5, %v1659_v30 }
0x16a2   : > { %v2755_v8 = vadd.f32 -1.0, %v1656_v7  ;;  %v2215_v7 = vld [vmem:[%s4282_s28] sm:$0x3f] }
0x16a4   : > { %1663 = vrot.lane.b32.xlu0 %v2755_v8, %s3566_s20  ;;  %v2231_v8 = vsub.s32 3, %v4149_v4 }
0x1716   : > { %v1664_v9 = vpop.permute.xlu0 %1663 }
0x1717   : > { %v1666_v10 = vmul.f32 %v3232_v5, %v1664_v9  ;;  %v2223_v9 = vsub.s32 1, %v4149_v4 }
0x1719   : > { %1668 = vrot.lane.b32.xlu1 %v1666_v10, %s3567_s0  ;;  %v2227_v10 = vsub.s32 2, %v4149_v4 }
0x171d   : > { %1001 = vrot.lane.b32.xlu1 %v4025_v6, %s3567_s0 }
0x1721   : > { %1227 = vrot.lane.b32.xlu1 %v4055_v51, %s3567_s0 }
0x1725   : > { %1453 = vrot.lane.b32.xlu1 %v1451_v34, %s3567_s0  ;;  %v3037_v34 = vpack.c.bf16 %v1779_v32, %v1773_v31 }
0x178b   : > { %v1669_v13 = vpop.permute.xlu1 %1668 }
0x178c   : > { %v1671_v14 = vadd.f32 %v1669_v13, %v1661_v11  ;;  %v2235_v11 = vsub.s32 4, %v4149_v4  ;;  %v2232_v13 = vrot.slane %v2215_v7, %v2231_v8 }
0x178e   : > { %3233 = vtanh.f32 %v1671_v14  ;;  %v2239_v14 = vsub.s32 5, %v4149_v4 }
0x178f   : > { %v1002_v15 = vpop.permute.xlu1 %1001 }
0x1790   : > { %1005 = vst.msk [vmem:[#allocation2] sm:$0x2] %vm1004_vm4, %v1002_v15  ;;  %v2224_v15 = vrot.slane %v2215_v7, %v2223_v9 }
0x1793   : > { %v1228_v16 = vpop.permute.xlu1 %1227 }
0x1794   : > { %1231 = vst.msk [vmem:[#allocation2] sm:$0x8] %vm1230_vm5, %v1228_v16 }
0x1797   : > { %v1454_v17 = vpop.permute.xlu1 %1453 }
0x1798   : > { %v3234_v19 = vpop.eup %3233  ;;  %1457 = vst.msk [vmem:[#allocation2] sm:$0x20] %vm1456_vm6, %v1454_v17 }
0x1799   : > { %1674 = vrot.lane.b32.xlu0 %v3234_v19, %s3566_s20 }
0x179d   : > { %1114 = vrot.lane.b32.xlu0 %v4040_v29, %s3567_s0  ;;  %v1778_v29 = vld [vmem:[#allocation15 + $0x38] sm:$0xff] }
0x179e   : > { %v3031_v25 = vpack.c.bf16 %v1778_v29, %v1772_v24  ;;  %v2236_v24 = vrot.slane %v2215_v7, %v2235_v11 }
0x17a0   : > { %3032 = vmatprep.subr.bf16.mxu0 %v3031_v25  ;;  %v2240_v25 = vrot.slane %v2215_v7, %v2239_v14 }
0x17a1   : > { %1340 = vrot.lane.b32.xlu0 %v4070_v12, %s3567_s0  ;;  %v1771_v12 = vld [vmem:[#allocation15] sm:$0xff] }
0x17a2   : > { %v3033_v26 = vpack.c.bf16 %v1777_v18, %v1771_v12 }
0x17a4   : > { %3034 = vmatpush1.bf16.msra.mxu0 %v3033_v26 }
0x17a5   : > { %1566 = vrot.lane.b32.xlu0 %v1564_v56, %s3567_s0  ;;  %3040 = vmatprep.subr.bf16.mxu0 %v3039_v38  ;;  %v1764_v56 = vld [vmem:[#allocation14 + $0x28] sm:$0xff] }
0x17a6   : > { %v3051_v60 = vpack.c.bf16 %v1770_v57, %v1764_v56 }
0x180b   : > { %v1675_v6 = vpop.permute.xlu0 %1674 }
0x180c   : > { %v1677_v51 = vmul.f32 %v3232_v5, %v1675_v6  ;;  %v2219_v5 = vsub.s32 0, %v4149_v4 }
0x180e   : > { %1679 = vrot.lane.b32.xlu1 %v1677_v51, %s3567_s0  ;;  %v2220_v30 = vrot.slane %v2215_v7, %v2219_v5  ;;  %v2228_v51 = vrot.slane %v2215_v7, %v2227_v10  ;;  %s3062_s0 = smul.u32 384, %s3658_s27  ;;  %s2546_s27 = scalar_lea.sflag [#allocation5], %s3932_s3 }
0x180f   : > { %v1115_v20 = vpop.permute.xlu0 %1114 }
0x1810   : > { %1118 = vst.msk [vmem:[#allocation2] sm:$0x4] %vm1117_vm7, %v1115_v20  ;;  %s4184_s16 = scalar_lea.hbm %s4283_s15, %s3062_s0 }
0x1812   : > { %2277 = vrot.lane.b32.xlu1 %v4119_v42, %s3566_s20 }
0x1813   : > { %v1341_v22 = vpop.permute.xlu0 %1340 }
0x1814   : > { %1344 = vst.msk [vmem:[#allocation2] sm:$0x10] %vm1343_vm8, %v1341_v22 }
0x1817   : > { %v1567_v23 = vpop.permute.xlu0 %1566 }
0x1818   : > { %1570 = vst.msk [vmem:[#allocation2] sm:$0x40] %vm1569_vm9, %v1567_v23 }
0x1880   : > { %v1680_v27 = vpop.permute.xlu1 %1679 }
0x1881   : > { %1683 = vst.msk [vmem:[#allocation2] sm:$0x80] %vm1682_vm10, %v1680_v27 }
0x1884   : > { %v2278_v16 = vpop.permute.xlu1 %2277 }
0x1888   : > { %v4110_v1 = vld [vmem:[#allocation2] sm:$0xff] }
0x1889   : > { %1686 = vrot.lane.b32.xlu0 %v4110_v1, %s3568_s25 }
0x18fb   : > { %v1687_v35 = vpop.permute.xlu0 %1686 }
0x18fc   : > { %2952 = vmatpush3.msra.mxu1 %v1687_v35 }
0x18fd   : > { %2954 = vmatmul.mubr.msk.f32.vlgmr.msra.gmra.mrb[10].mxu1 %vm550_vm1, %v3971_v3  ;;  %3036 = vmatprep.subr.bf16.mxu1 %v3035_v33  ;;  %v4124_v3 = vld [vmem:[%s4281_s12] sm:$0xff]  ;;  %s3469_s12 = scalar_lea.vmem %s3468_s2, 768 }
0x18fe   : > { %3038 = vmatpush1.bf16.msra.mxu1 %v3037_v34  ;;  %1922 = vmatprep.mubr.f32.mxu1 %v3563_v0 }
0x18ff   : > { %3048 = vmatprep.subr.bf16.mxu1 %v3047_v41  ;;  %2282 = vrot.lane.b32.xlu0 %v4124_v3, %s3566_s20 }
0x1971   : > { %v2283_v17 = vpop.permute.xlu0 %2282 }
0x19d0   : > { %v1755_v55 = vpop.f32.mrb[10].mxu1 }
0x19d1   : > { %2757 = vmatmul.mubr.msk.f32.vlgmr.msra.gmra.mrb[12].mxu0 %vm1783_vm11, %v1755_v55  ;;  %2758 = vmatmul.mubr.msk.f32.vlgmr.msra.gmra.mrb[12].mxu1 %vm1783_vm11, %v1755_v55  ;;  %v2955_v58 = vpop.f32.mrb[11].mxu1 }
0x19d2   : > { %3042 = vmatpush1.bf16.msra.mxu0 %v3041_v49  ;;  %1993 = vmatprep.mubr.f32.mxu0 %v3563_v0 }
0x19d3   : > { %3050 = vmatpush1.bf16.msra.mxu1 %v3049_v50  ;;  %3044 = vmatprep.subr.bf16.mxu0 %v3043_v52  ;;  %v2265_v50 = vand.u32 127, %v2217_v2  ;;  %v2763_v52 = vld [vmem:[%s479_s17] ss:$0 sm:$0xff] }
0x19d4   : > { %2137 = vmatprep.mubr.f32.mxu1 %v3563_v0  ;;  %2956 = vmatprep.subr.mxu1 %v3563_v0  ;;  %v2270_v53 = vsub.f32 1.0, %v2763_v52  ;;  %v2269_v56 = vmul.f32 0.125, %v2763_v52 }
0x19d5   : > { %2759 = vmatmul.mubr.msk.f32.vlgmr.msra.gmra.mrb[14].mxu0 %vm1783_vm11, %v1755_v55  ;;  %vm2266_vm13 = vcmp.gt.s32.totalorder %v4149_v4, %v2265_v50 }
0x19d6   : > { %3046 = vmatpush1.bf16.msra.mxu0 %v3045_v59  ;;  %2066 = vmatprep.mubr.f32.mxu0 %v3563_v0  ;;  %v2764_v54 = vsel %vm2266_vm13, 1.0, %v3563_v0 }
0x19d7   : > { %3052 = vmatprep.subr.bf16.mxu0 %v3051_v60  ;;  %v2271_v55 = vadd.f32 %v2764_v54, %v2270_v53 }
0x19d9   : > { %2760 = vmatmul.mubr.msk.f32.vlgmr.msra.gmra.mrb[12].mxu0 %vm1783_vm11, %v4110_v1  ;;  %2761 = vmatmul.mubr.msk.f32.vlgmr.msra.gmra.mrb[12].mxu1 %vm1783_vm11, %v4110_v1  ;;  %v2272_v57 = vmul.f32 1.25e+11, %v2271_v55 }
0x19da   : > { %3054 = vmatpush1.bf16.msra.mxu0 %v3053_v63  ;;  %2208 = vmatprep.mubr.f32.mxu0 %v3563_v0 }
0x19db   : > { %2958 = vmatprep.mubr.msk.f32.mxu1 %vm3564_vm0, %v3563_v0  ;;  %2966 = vmatprep.subr.mxu0 %v3563_v0 }
0x19dd   : > { %2762 = vmatmul.mubr.msk.f32.vlgmr.msra.gmra.mrb[14].mxu0 %vm1783_vm11, %v4110_v1 }
0x19de   : > { %2968 = vmatprep.mubr.msk.f32.mxu0 %vm3564_vm0, %v3563_v0 }
0x1aac   : > { %v2068_v19 = vpop.f32.mrb[12].mxu0  ;;  %v2139_v6 = vpop.f32.mrb[12].mxu1 }
0x1aad   : > { %v2247_v20 = vadd.f32 %v2220_v30, %v2068_v19  ;;  %v2070_v22 = vpop.f32.mrb[13].mxu0  ;;  %v2141_v23 = vpop.f32.mrb[13].mxu1  ;;  %v2249_v27 = vadd.f32 %v2228_v51, %v2139_v6 }
0x1aae   : > { %v2250_v29 = vadd.f32 %v2232_v13, %v2141_v23  ;;  %v2248_v18 = vadd.f32 %v2224_v15, %v2070_v22 }
0x1aaf   : > { %v2273_v12 = vmul.f32 %v4119_v42, %v2247_v20  ;;  %v2280_v26 = vmul.f32 %v2278_v16, %v2247_v20  ;;  %v2457_v40 = vmul.f32 %v4119_v42, %v2249_v27  ;;  %v2460_v41 = vmul.f32 %v2278_v16, %v2249_v27 }
0x1ab0   : > { %v2274_v1 = vmul.f32 %v4124_v3, %v2250_v29  ;;  %v2285_v21 = vmul.f32 %v2283_v17, %v2250_v29  ;;  %v2210_v28 = vpop.f32.mrb[14].mxu0  ;;  %v2369_v36 = vmul.f32 %v4119_v42, %v2248_v18  ;;  %v2372_v37 = vmul.f32 %v2278_v16, %v2248_v18 }
0x1ab1   : > { %v2251_v31 = vadd.f32 %v2236_v24, %v2210_v28  ;;  %v2212_v32 = vpop.f32.mrb[15].mxu0 }
0x1ab2   : > { %v2275_v33 = vadd.f32 %v2274_v1, %v2273_v12  ;;  %v2252_v34 = vadd.f32 %v2240_v25, %v2212_v32  ;;  %v2286_v35 = vadd.f32 %v2285_v21, %v2280_v26 }
0x1ab3   : > { %v2370_v38 = vmul.f32 %v4124_v3, %v2251_v31  ;;  %v2373_v39 = vmul.f32 %v2283_v17, %v2251_v31 }
0x1ab4   : > { %v2458_v43 = vmul.f32 %v4124_v3, %v2252_v34  ;;  %v2461_v44 = vmul.f32 %v2283_v17, %v2252_v34  ;;  %2288 = vrot.lane.b32.xlu1 %v2286_v35, %s3566_s20 }
0x1ab5   : > { %v2371_v45 = vadd.f32 %v2370_v38, %v2369_v36  ;;  %v2374_v46 = vadd.f32 %v2373_v39, %v2372_v37 }
0x1ab6   : > { %v2459_v47 = vadd.f32 %v2458_v43, %v2457_v40  ;;  %v2462_v48 = vadd.f32 %v2461_v44, %v2460_v41 }
0x1ab7   : > { %2376 = vrot.lane.b32.xlu0 %v2374_v46, %s3566_s20 }
0x1ab8   : > { %2464 = vrot.lane.b32.xlu1 %v2462_v48, %s3566_s20  ;;  %s2559_s20 = sshll.u32 %s547_s8, 4  ;;  %s4179_s20 = int_to_ptr.vmem [resolvable:$true] %s2559_s20 }
0x1ab9   : > { %s3463_s26 = scalar_lea.vmem %s4179_s20, 384  ;;  %p3470_p3 = scmp.lt.s32.totalorder %s4179_s20, %s3468_s2 }
0x1aba   : > { %p3464_p4 = scmp.ne.s32.totalorder %s4179_s20, %s3463_s26  ;;  %p3471_p8 = scmp.lt.s32.totalorder %s3469_s12, %s3463_s26 }
0x1abc   : > { %p3465_p5 = pnand %p3464_p4, %p4284_p10  ;;  %p3472_p6 = por %p3471_p8, %p3470_p3 }
0x1abe   : > { %p3466_p7 = pneg %p3465_p5 }
0x1ac0   : > { %p3473_p11 = pnand %p3472_p6, %p3466_p7 }
0x1b26   : > { %v2289_v49 = vpop.permute.xlu1 %2288 }
0x1b27   : > { %2957 = vmatpush3.xpose.msk.msra.mxu1 %vm2290_vm12, %v2289_v49 }
0x1b28   : > { %2961 = vmatprep.subr.mxu1 %v3563_v0 }
0x1b29   : > { %v2377_v42 = vpop.permute.xlu0 %2376 }
0x1b2a   : > { %2959 = vmatmul.mubr.msk.f32.vlgmr.msra.gmra.mrb[14].mxu1 %vm2290_vm12, %v2275_v33  ;;  %v2465_v3 = vpop.permute.xlu1 %2464 }
0x1b2b   : > { %2962 = vmatpush3.xpose.msk.msra.mxu1 %vm2290_vm12, %v2377_v42  ;;  %2967 = vmatpush3.xpose.msk.msra.mxu0 %vm2290_vm12, %v2465_v3 }
0x1b2c   : > { %2963 = vmatprep.mubr.msk.f32.mxu1 %vm3564_vm0, %v3563_v0 }
0x1b2e   : > { %2964 = vmatmul.mubr.msk.f32.vlgmr.msra.gmra.mrb[16].mxu1 %vm2290_vm12, %v2371_v45  ;;  %2969 = vmatmul.mubr.msk.f32.vlgmr.msra.gmra.mrb[16].mxu0 %vm2290_vm12, %v2459_v47 }
0x1bfd   : > { %v2362_v58 = vpop.f32.mrb[14].mxu1 }
0x1bfe   : > { %v2366_v59 = vmul.f32 %v2362_v58, %v2269_v56  ;;  %v2960_v60 = vpop.f32.mrb[15].mxu1 }
0x1c00   : > { %v2367_v61 = vsub.f32 %v2366_v59, %v2272_v57 }
0x1c01   : > { %v2449_v62 = vpop.f32.mrb[16].mxu1  ;;  %v2537_v63 = vpop.f32.mrb[16].mxu0 }
0x1c02   : > { %2368 = vst.msk [vmem:[%s547_s8] sm:$0xff] %vm550_vm1, %v2367_v61  ;;  %v2453_v0 = vmul.f32 %v2449_v62, %v2269_v56  ;;  %v2541_v2 = vmul.f32 %v2537_v63, %v2269_v56  ;;  %v2965_v4 = vpop.f32.mrb[17].mxu1  ;;  %v2970_v5 = vpop.f32.mrb[17].mxu0 }
0x1c04   : > { %v2454_v7 = vsub.f32 %v2453_v0, %v2272_v57  ;;  %v2542_v8 = vsub.f32 %v2541_v2, %v2272_v57 }
0x1c06   : > { %2769 = vst.msk [vmem:[%s547_s8 + $0x8] sm:$0xff] %vm550_vm1, %v2454_v7  ;;  %2772 = vst.msk [vmem:[%s547_s8 + $0x10] sm:$0xff] %vm550_vm1, %v2542_v8 }
0x1c07   : > { %3476 = shalt.err (!%p3473_p11)
}
0x1c08   : > { %s3477_s9 = scalar_lea.hbm %s4184_s16, 384  ;;  %s3481_s18 = scalar_lea.hbm %s4283_s15, 768 }
0x1c09   : > { %p3478_p9 = scmp.ne.s32.totalorder %s4184_s16, %s3477_s9  ;;  %p3482_p13 = scmp.lt.u32.totalorder %s4184_s16, %s4283_s15 }
0x1c0a   : > { %p3483_p0 = scmp.lt.u32.totalorder %s3481_s18, %s3477_s9  ;;  %p3485_p4 = scmp.lt.u32.totalorder %s3477_s9, %s4184_s16 }
0x1c0b   : > { %p3479_p12 = pnand %p3478_p9, %p4284_p10 }
0x1c0c   : > { %p3484_p2 = por %p3483_p0, %p3482_p13 }
0x1c0d   : > { %p3480_p1 = pneg %p3479_p12 }
0x1c0e   : > { %p3486_p5 = por %p3485_p4, %p3484_p2 }
0x1c10   : > { %p3487_p7 = pnand %p3486_p5, %p3480_p1 }
0x1c12   : > { %3490 = shalt.err (!%p3487_p7)
}
0x1c13   : > { %s3570_s17 = smov 128   ;;  %s3571_s25 = smov 8  }
0x1c14   : > { %3091 = dma.vmem_to_hbm [thread:$0]  (%p4284_p10), %s4179_s20, 384, %s4184_s16, %s2546_s27, %s3570_s17, %s3570_s17, %s3571_s25  }
0x1c15 PF: > { %s2574_s26 = sand.u32 1, %s3537_s21   ;;  %p4285_p3 = scmp.ne.s32.totalorder %s4266_s30, 0 }
0x1c16   : > { %p4286_p8 = scmp.ge.s32.totalorder %s3549_s24, 2  ;;  %s2575_s29 = scalar_lea.sflag [#allocation5], %s2574_s26 }
0x1c18   : > { %p3120_p6 = pnand %p4286_p8, %p4285_p3 }
0x1c1a   : > { %3532 = dma.done.wait (!%p3120_p6), %s2575_s29, 384  }
0x1c1b   : > { %3534 = vsyncadd (!%p3120_p6), %s2575_s29, 4294966912  ;;  %p31_p11 = scmp.ge.s32.totalorder %s3823_s13, 4   ;;  %s4287_s21 = smov %s3541_s22 }
0x1c1c   : > { %s4288_s22 = smov %s3545_s23  ;;  %s4289_s23 = smov %s3834_s14 }
0x1c1d   : > { %s4290_s24 = smov %s3823_s13  ;;  %33 = sbr.rel (!%p31_p11) target bundleno = 18 (0x12), region = 152 }
0x1c24   :  { %2580 = vsyncpa [#allocation4], 1 }
0x1c25   :  { %2582 = vsyncpa [#allocation4 + $0x1], 1 }
0x1c26   :  { %2583 = vsyncpa [#allocation7], 1 }
0x1c27   :  { %2585 = vsyncpa [#allocation7 + $0x1], 1 }
0x1c28   :  { %2586 = vsyncpa [#allocation10], 1 }
0x1c29   :  { %2587 = vsyncpa [#allocation13], 1 }
0x1c2a   :  { %2588 = vsyncpa [#allocation16], 1 }
0x1c2b   :  { %2589 = vsyncpa [#allocation5], 1 }
0x1c2c   :  { %2591 = vsyncpa [#allocation5 + $0x1], 1 }

</bundles_post_ra>
